<compile_context>
chip_gen: v6e
topology: v6e:2x2x1
jax: 0.10.0
libtpu: 0.0.40
codegen_flags: <defaults>
</compile_context>

<pallas_src>
import math
from functools import partial

import jax
import jax.numpy as jnp
from jax.experimental import pallas as pl
from jax.experimental.pallas import tpu as pltpu

# ----------------------------- model config (small, synthetic) --------------
BATCH = 2            # batch_size (small, stands in for 64)
SEQ = 8              # max_len    (small, stands in for 64)
HIDDEN = 32          # hidden_size (stands in for 768)
N_HEADS = 4
HEAD_DIM = HIDDEN // N_HEADS
FFN = 64
N_LAYERS = 2
VOCAB = 50
NUM_CLASSES = 7
NUM_CLASSES_PAD = 128        # lane-dense classifier output (full-width vst)
SMALL_W = max(3 * HIDDEN, FFN, HIDDEN)   # width of packed per-layer small tensors
LN_EPS = 1e-12

_NEG = jnp.finfo(jnp.float32).min


# ----------------------------- in-kernel helpers ------------------------------
def _layer_norm(x, g, b, eps=LN_EPS):
    """Single-pass LayerNorm: one sum + one sum-of-squares lane reduction."""
    n = x.shape[-1]
    inv_n = 1.0 / n
    s = jnp.sum(x, axis=-1, keepdims=True)
    ss = jnp.sum(x * x, axis=-1, keepdims=True)
    mu = s * inv_n
    var = ss * inv_n - mu * mu
    return (x - mu) * jax.lax.rsqrt(var + eps) * g + b


# ----------------------------- fused encoder kernel ---------------------------
def encoder_kernel(x_ref, valid_ref, embln_ref,
                   wqkv_ref, wo_ref, w1_ref, w2_ref, small_ref,
                   wc_ref, bc_ref,
                   logits_ref, h_scr, *, n_heads):
    # grid = (core_shards [parallel], layer [arbitrary], tile-in-shard [arbitrary])
    l = pl.program_id(1)
    bi = pl.program_id(2)

    _, TB, S, H = h_scr.shape
    N = TB * S
    dh = H // n_heads
    FFNW = w1_ref.shape[-1]
    NCP = wc_ref.shape[-1]
    bf16 = jnp.bfloat16

    # ---- packed per-layer small tensors (one DMA per layer step) -------------
    small = small_ref[0]                     # (8, SMALL_W) f32
    bqkv = small[0:1, 0:3 * H]
    bo = small[1:2, 0:H]
    ln1g = small[2:3, 0:H]
    ln1b = small[3:4, 0:H]
    b1 = small[4:5, 0:FFNW]
    b2 = small[5:6, 0:H]
    ln2g = small[6:7, 0:H]
    ln2b = small[7:8, 0:H]

    # ---- prologue (l == 0): embedding LayerNorm into the VMEM carry ----------
    @pl.when(l == 0)
    def _():
        xe = x_ref[...].astype(jnp.float32).reshape(N, H)
        h_scr[bi] = _layer_norm(
            xe, embln_ref[0:1, :], embln_ref[1:2, :]).reshape(TB, S, H)

    # attention mask recomputed on the fly (gen_attention_mask equivalent):
    # key position k is valid iff k < valid_length[b]   (valid_length >= 1)
    valid = valid_ref[...].reshape(TB, 1)
    col = jax.lax.broadcasted_iota(jnp.int32, (TB, S), 1)
    key_keep = (col < valid)[:, None, :]                 # (TB, 1, S) key-axis mask

    x3 = h_scr[bi]                                       # (TB, S, H) f32 carry
    xb = x3.reshape(N, H).astype(bf16)

    # fused QKV projection: one (N,H)@(H,3H) MXU matmul (1/sqrt(dh) folded
    # into Wq/bq at pack time); f32 accumulation; slices cast to bf16 at once
    # so the f32 (N,3H) temporary dies immediately.
    qkv = jnp.dot(xb, wqkv_ref[0], preferred_element_type=jnp.float32) + bqkv
    q3 = qkv[:, 0 * H:1 * H].astype(bf16).reshape(TB, S, H)
    k3 = qkv[:, 1 * H:2 * H].astype(bf16).reshape(TB, S, H)
    v3 = qkv[:, 2 * H:3 * H].astype(bf16).reshape(TB, S, H)

    # per-head score/context (single-batch-dim 3-D dot_general form), heads
    # concatenated once so the output projection is a single K=H matmul.
    # TODO(synk): switch to head-batched einshape layout at real head_dim=64.
    ctx_heads = []
    for h in range(n_heads):                             # static unroll, small
        lo = h * dh
        qh = q3[:, :, lo:lo + dh]
        kh = k3[:, :, lo:lo + dh]
        vh = v3[:, :, lo:lo + dh]
        sc = jnp.einsum('bqd,bkd->bqk', qh, kh,
                        preferred_element_type=jnp.float32)
        sc = jnp.where(key_keep, sc, _NEG)
        # explicit softmax: divide replaced by EUP reciprocal (approx)
        m = jnp.max(sc, axis=-1, keepdims=True)
        e = jnp.exp(sc - m)
        p = e * pl.reciprocal(jnp.sum(e, axis=-1, keepdims=True), approx=True)
        ctx_heads.append(jnp.einsum('bqk,bkd->bqd', p.astype(bf16), vh,
                                    preferred_element_type=jnp.float32))
    ctx = jnp.concatenate(ctx_heads, axis=-1).reshape(N, H)

    attn = jnp.dot(ctx.astype(bf16), wo_ref[0],
                   preferred_element_type=jnp.float32) + bo

    # sa_layer_norm (post-LN residual), f32
    h1 = _layer_norm(x3.reshape(N, H) + attn, ln1g, ln1b)

    # FFN: Lin -> GELU -> Lin (bf16 MXU inputs, f32 accumulation)
    ff = jnp.dot(h1.astype(bf16), w1_ref[0],
                 preferred_element_type=jnp.float32) + b1
    # TODO(synk): torch.nn.GELU default is erf; tanh approximation used here
    #             (Mosaic-safe EUP path) -> small systematic numeric deviation.
    ff = jax.nn.gelu(ff, approximate=True)
    ff = jnp.dot(ff.astype(bf16), w2_ref[0],
                 preferred_element_type=jnp.float32) + b2

    h2 = _layer_norm(h1 + ff, ln2g, ln2b)
    h2_3d = h2.reshape(TB, S, H)
    h_scr[bi] = h2_3d                                    # carry to next layer

    # ---- CLS-token classifier (lane-padded to 128) ----------------------------
    # Written every step (one tiny (TB,H)x(H,128) matmul) so output writebacks
    # are always deterministic; only the last layer's value survives the final
    # HBM flush for this batch tile.
    cls = h2_3d[:, 0, :]                                 # (TB, H) CLS token
    logits = jnp.dot(cls.astype(bf16), wc_ref[...],
                     preferred_element_type=jnp.float32) + bc_ref[...]
    logits_ref[...] = logits.reshape(1, TB, NCP)


# ----------------------------- parameter init / packing -----------------------
def init_params(key):
    """Parameters analogous to the torch module, pre-packed for the kernel:
    weights stored [in, out] (transposed vs nn.Linear), per-layer tensors
    stacked along a leading layer axis, matmul weights bf16, attention scale
    folded into Wq/bq, biases + LN params packed into one (L, 8, W) block,
    classifier lane-padded to 128."""
    std = 0.02
    ks = iter(jax.random.split(key, 4 + 12 * N_LAYERS))

    def nrm(shape):
        return std * jax.random.normal(next(ks), shape, jnp.float32)

    tok_emb = nrm((VOCAB, HIDDEN))
    pos_emb = nrm((SEQ, HIDDEN))

    emb_ln = jnp.stack([jnp.ones((HIDDEN,), jnp.float32),     # gamma
                        jnp.zeros((HIDDEN,), jnp.float32)])   # beta  -> (2, H)

    scale = 1.0 / math.sqrt(HEAD_DIM)
    wqkv_l, wo_l, w1_l, w2_l, small_l = [], [], [], [], []
    for _ in range(N_LAYERS):
        wq = nrm((HIDDEN, HIDDEN)) * scale      # fold 1/sqrt(dh) into Wq
        wk = nrm((HIDDEN, HIDDEN))
        wv = nrm((HIDDEN, HIDDEN))
        bq = nrm((HIDDEN,)) * scale             # ... and into bq
        bk = nrm((HIDDEN,))
        bv = nrm((HIDDEN,))
        wo = nrm((HIDDEN, HIDDEN)); bo = nrm((HIDDEN,))
        w1 = nrm((HIDDEN, FFN));    b1 = nrm((FFN,))
        w2 = nrm((FFN, HIDDEN));    b2 = nrm((HIDDEN,))
        ln1g = jnp.ones((HIDDEN,), jnp.float32)
        ln1b = jnp.zeros((HIDDEN,), jnp.float32)
        ln2g = jnp.ones((HIDDEN,), jnp.float32)
        ln2b = jnp.zeros((HIDDEN,), jnp.float32)

        wqkv_l.append(jnp.concatenate([wq, wk, wv], axis=-1))   # (H, 3H)
        wo_l.append(wo); w1_l.append(w1); w2_l.append(w2)

        rows = jnp.zeros((8, SMALL_W), jnp.float32)
        rows = rows.at[0, :3 * HIDDEN].set(jnp.concatenate([bq, bk, bv]))
        rows = rows.at[1, :HIDDEN].set(bo)
        rows = rows.at[2, :HIDDEN].set(ln1g)
        rows = rows.at[3, :HIDDEN].set(ln1b)
        rows = rows.at[4, :FFN].set(b1)
        rows = rows.at[5, :HIDDEN].set(b2)
        rows = rows.at[6, :HIDDEN].set(ln2g)
        rows = rows.at[7, :HIDDEN].set(ln2b)
        small_l.append(rows)

    wc = nrm((HIDDEN, NUM_CLASSES))
    bc = nrm((NUM_CLASSES,))
    wc_pad = jnp.zeros((HIDDEN, NUM_CLASSES_PAD), jnp.float32)
    wc_pad = wc_pad.at[:, :NUM_CLASSES].set(wc)
    bc_pad = jnp.zeros((1, NUM_CLASSES_PAD), jnp.float32)
    bc_pad = bc_pad.at[0, :NUM_CLASSES].set(bc)

    bf16 = jnp.bfloat16
    return {
        'tok_emb': tok_emb,
        'pos_emb': pos_emb,
        'emb_ln': emb_ln,                               # (2, H) f32
        'wqkv': jnp.stack(wqkv_l).astype(bf16),         # (L, H, 3H)
        'wo': jnp.stack(wo_l).astype(bf16),             # (L, H, H)
        'w1': jnp.stack(w1_l).astype(bf16),             # (L, H, FFN)
        'w2': jnp.stack(w2_l).astype(bf16),             # (L, FFN, H)
        'small': jnp.stack(small_l),                    # (L, 8, SMALL_W) f32
        'wc': wc_pad.astype(bf16),                      # (H, 128)
        'bc': bc_pad,                                   # (1, 128) f32
    }


# ----------------------------- VMEM budget per part ---------------------------
def _vmem_limit_bytes():
    # ~3/4 of physical VMEM: ≈48 MiB on v7x (64 MiB/TC), ≈96 MiB on v5e/v6e.
    try:
        cap = pltpu.get_tpu_info().vmem_capacity_bytes
    except Exception:
        cap = 64 * 1024 * 1024
    return int(cap) * 3 // 4


# ----------------------------- forward (wrapper / glue) ----------------------
def bert_classifier_forward(params, token_ids, valid_length, *,
                            core_shards=2, batch_tile=1):
    B, S = token_ids.shape
    H, L, FF = HIDDEN, N_LAYERS, FFN
    NCP = NUM_CLASSES_PAD
    TB = batch_tile
    n_tiles = B // TB
    assert n_tiles * TB == B and n_tiles % core_shards == 0
    TPS = n_tiles // core_shards     # batch tiles per core shard
    f32 = jnp.float32

    # embedding table gathers are plain-JAX glue; activations fed in bf16
    # (halves the x DMA + its double-buffered VMEM footprint).
    x = (params['tok_emb'][token_ids]
         + params['pos_emb'][:S][None, :, :]).astype(jnp.bfloat16)
    valid = valid_length.reshape(B, 1, 1).astype(jnp.int32)

    bt_map = lambda c, l, bi: (c * TPS + bi, 0, 0)   # per batch tile
    wl_map = lambda c, l, bi: (l, 0, 0)              # per layer (DMA elided across bi)
    c2_map = lambda c, l, bi: (0, 0)                 # grid-invariant 2-D

    in_specs = [
        pl.BlockSpec((TB, S, H), bt_map),            # x (bf16 embeddings)
        pl.BlockSpec((TB, 1, 1), bt_map),            # valid_length
        pl.BlockSpec((2, H), c2_map),                # embedding LN gamma/beta
        pl.BlockSpec((1, H, 3 * H), wl_map),         # wqkv (bf16)
        pl.BlockSpec((1, H, H), wl_map),             # wo (bf16)
        pl.BlockSpec((1, H, FF), wl_map),            # w1 (bf16)
        pl.BlockSpec((1, FF, H), wl_map),            # w2 (bf16)
        pl.BlockSpec((1, 8, SMALL_W), wl_map),       # packed biases / LN params
        pl.BlockSpec((H, NCP), c2_map),              # classifier weight (lane-dense)
        pl.BlockSpec((1, NCP), c2_map),              # classifier bias
    ]
    args = (x, valid, params['emb_ln'],
            params['wqkv'], params['wo'], params['w1'], params['w2'],
            params['small'], params['wc'], params['bc'])

    # advisory cost estimate: weights stream once per core shard (grid fix),
    # activations re-read once per layer, logits flushed per step.
    n_tok = B * S
    mm_layer = (2 * n_tok * H * 3 * H            # QKV
                + 2 * 2 * B * S * S * H          # scores + context (all heads)
                + 2 * n_tok * H * H              # output projection
                + 2 * 2 * n_tok * H * FF)        # FFN
    flops = L * (mm_layer + 2 * B * H * NCP)
    transcendentals = L * (B * N_HEADS * S * S + n_tok * FF)
    weight_bytes = sum(int(params[k].size) * params[k].dtype.itemsize
                       for k in ('wqkv', 'wo', 'w1', 'w2', 'small',
                                 'wc', 'bc', 'emb_ln'))
    bytes_accessed = (core_shards * weight_bytes
                      + L * (int(x.size) * x.dtype.itemsize
                             + int(valid.size) * 4)
                      + L * B * NCP * 4)

    logits_pad = pl.pallas_call(
        partial(encoder_kernel, n_heads=N_HEADS),
        out_shape=jax.ShapeDtypeStruct((n_tiles, TB, NCP), f32),
        grid_spec=pltpu.PrefetchScalarGridSpec(
            num_scalar_prefetch=0,
            grid=(core_shards, L, TPS),              # (core shard, layer, tile)
            in_specs=in_specs,
            out_specs=pl.BlockSpec((1, TB, NCP), bt_map),
            scratch_shapes=[pltpu.VMEM((TPS, TB, S, H), f32)],  # activation carry
        ),
        compiler_params=pltpu.CompilerParams(
            dimension_semantics=("parallel", "arbitrary", "arbitrary"),
            vmem_limit_bytes=_vmem_limit_bytes()),
        cost_estimate=pl.CostEstimate(flops=int(flops),
                                      transcendentals=int(transcendentals),
                                      bytes_accessed=int(bytes_accessed)),
    )(*args)

    # pooler = hidden_state[:, 0]; dropout; classifier (all fused in-kernel).
    # TODO(synk): train-mode nn.Dropout omitted (dr_rate=None / eval semantics
    #             -> identity); the torch reference also has a latent NameError
    #             when dr_rate is None.
    return logits_pad.reshape(B, NCP)[:, :NUM_CLASSES]


# ----------------------------- main -------------------------------------------
if __name__ == "__main__":
    key = jax.random.PRNGKey(0)
    k_param, k_tok, k_len = jax.random.split(key, 3)

    params = init_params(k_param)
    token_ids = jax.random.randint(k_tok, (BATCH, SEQ), 0, VOCAB, dtype=jnp.int32)
    valid_length = jax.random.randint(k_len, (BATCH,), 1, SEQ + 1, dtype=jnp.int32)

    logits = jax.jit(bert_classifier_forward)(params, token_ids, valid_length)
    logits = jax.block_until_ready(logits)
    assert logits.shape == (BATCH, NUM_CLASSES)
    assert bool(jnp.all(jnp.isfinite(logits)))
    print("KERNEL_OK")
</pallas_src>

<mosaic_0001>
module attributes {stable_mosaic.version = 11 : i64} {
  func.func @encoder_kernel(%arg0: i32, %arg1: i32, %arg2: i32, %arg3: memref<1x8x32xbf16, #tpu.memory_space<vmem>>, %arg4: memref<1x1x1xi32, #tpu.memory_space<vmem>>, %arg5: memref<2x32xf32, #tpu.memory_space<vmem>>, %arg6: memref<1x32x96xbf16, #tpu.memory_space<vmem>>, %arg7: memref<1x32x32xbf16, #tpu.memory_space<vmem>>, %arg8: memref<1x32x64xbf16, #tpu.memory_space<vmem>>, %arg9: memref<1x64x32xbf16, #tpu.memory_space<vmem>>, %arg10: memref<1x8x96xf32, #tpu.memory_space<vmem>>, %arg11: memref<32x128xbf16, #tpu.memory_space<vmem>>, %arg12: memref<1x128xf32, #tpu.memory_space<vmem>>, %arg13: memref<1x1x128xf32, #tpu.memory_space<vmem>>, %arg14: memref<1x1x8x32xf32, #tpu.memory_space<vmem>>) attributes {dimension_semantics = [#tpu.dimension_semantics<parallel>, #tpu.dimension_semantics<arbitrary>, #tpu.dimension_semantics<arbitrary>], iteration_bounds = array<i64: 2, 2, 1>, scalar_prefetch = 0 : i64, scratch_operands = 1 : i64, tpu.core_type = #tpu.core_type<tc>, window_params = [{transform_indices = @transform_0, window_bounds = array<i64: 1, 8, 32>}, {transform_indices = @transform_1, window_bounds = array<i64: 1, 1, 1>}, {pipeline_mode = #tpu.pipeline_mode<synchronous>, transform_indices = @transform_2, window_bounds = array<i64: 2, 32>}, {transform_indices = @transform_3, window_bounds = array<i64: 1, 32, 96>}, {transform_indices = @transform_4, window_bounds = array<i64: 1, 32, 32>}, {transform_indices = @transform_5, window_bounds = array<i64: 1, 32, 64>}, {transform_indices = @transform_6, window_bounds = array<i64: 1, 64, 32>}, {transform_indices = @transform_7, window_bounds = array<i64: 1, 8, 96>}, {pipeline_mode = #tpu.pipeline_mode<synchronous>, transform_indices = @transform_8, window_bounds = array<i64: 32, 128>}, {pipeline_mode = #tpu.pipeline_mode<synchronous>, transform_indices = @transform_9, window_bounds = array<i64: 1, 128>}, {transform_indices = @transform_10, window_bounds = array<i64: 1, 1, 128>}]} {
    %c0 = arith.constant 0 : index
    %c0_0 = arith.constant 0 : index
    %c0_1 = arith.constant 0 : index
    %0 = vector.load %arg10[%c0, %c0_0, %c0_1] : memref<1x8x96xf32, #tpu.memory_space<vmem>>, vector<1x8x96xf32>
    %1 = vector.shape_cast %0 : vector<1x8x96xf32> to vector<8x96xf32>
    %2 = vector.extract_strided_slice %1 {offsets = [0, 0], sizes = [1, 96], strides = [1, 1]} : vector<8x96xf32> to vector<1x96xf32>
    %3 = vector.extract_strided_slice %1 {offsets = [1, 0], sizes = [1, 32], strides = [1, 1]} : vector<8x96xf32> to vector<1x32xf32>
    %4 = vector.extract_strided_slice %1 {offsets = [2, 0], sizes = [1, 32], strides = [1, 1]} : vector<8x96xf32> to vector<1x32xf32>
    %5 = vector.extract_strided_slice %1 {offsets = [3, 0], sizes = [1, 32], strides = [1, 1]} : vector<8x96xf32> to vector<1x32xf32>
    %6 = vector.extract_strided_slice %1 {offsets = [4, 0], sizes = [1, 64], strides = [1, 1]} : vector<8x96xf32> to vector<1x64xf32>
    %7 = vector.extract_strided_slice %1 {offsets = [5, 0], sizes = [1, 32], strides = [1, 1]} : vector<8x96xf32> to vector<1x32xf32>
    %8 = vector.extract_strided_slice %1 {offsets = [6, 0], sizes = [1, 32], strides = [1, 1]} : vector<8x96xf32> to vector<1x32xf32>
    %9 = vector.extract_strided_slice %1 {offsets = [7, 0], sizes = [1, 32], strides = [1, 1]} : vector<8x96xf32> to vector<1x32xf32>
    %c0_i32 = arith.constant 0 : i32
    %10 = arith.cmpi eq, %arg1, %c0_i32 : i32
    %11 = arith.extui %10 : i1 to i32
    %c0_i32_2 = arith.constant 0 : i32
    %12 = arith.cmpi ne, %11, %c0_i32_2 : i32
    scf.if %12 {
      %c0_69 = arith.constant 0 : index
      %c0_70 = arith.constant 0 : index
      %c0_71 = arith.constant 0 : index
      %212 = vector.load %arg3[%c0_69, %c0_70, %c0_71] : memref<1x8x32xbf16, #tpu.memory_space<vmem>>, vector<1x8x32xbf16>
      %213 = arith.extf %212 : vector<1x8x32xbf16> to vector<1x8x32xf32>
      %214 = vector.shape_cast %213 : vector<1x8x32xf32> to vector<8x32xf32>
      %c0_72 = arith.constant 0 : index
      %c0_73 = arith.constant 0 : index
      %215 = vector.load %arg5[%c0_72, %c0_73] : memref<2x32xf32, #tpu.memory_space<vmem>>, vector<1x32xf32>
      %c1 = arith.constant 1 : index
      %c0_74 = arith.constant 0 : index
      %216 = vector.load %arg5[%c1, %c0_74] : memref<2x32xf32, #tpu.memory_space<vmem>>, vector<1x32xf32>
      %cst_75 = arith.constant dense<0.000000e+00> : vector<8xf32>
      %217 = vector.multi_reduction <add>, %214, %cst_75 [1] : vector<8x32xf32> to vector<8xf32>
      %218 = vector.shape_cast %217 : vector<8xf32> to vector<8x1xf32>
      %219 = arith.mulf %214, %214 : vector<8x32xf32>
      %cst_76 = arith.constant dense<0.000000e+00> : vector<8xf32>
      %220 = vector.multi_reduction <add>, %219, %cst_76 [1] : vector<8x32xf32> to vector<8xf32>
      %221 = vector.shape_cast %220 : vector<8xf32> to vector<8x1xf32>
      %cst_77 = arith.constant 3.125000e-02 : f32
      %222 = vector.broadcast %cst_77 : f32 to vector<8x1xf32>
      %223 = arith.mulf %218, %222 : vector<8x1xf32>
      %cst_78 = arith.constant 3.125000e-02 : f32
      %224 = vector.broadcast %cst_78 : f32 to vector<8x1xf32>
      %225 = arith.mulf %221, %224 : vector<8x1xf32>
      %226 = arith.mulf %223, %223 : vector<8x1xf32>
      %227 = arith.subf %225, %226 : vector<8x1xf32>
      %228 = vector.broadcast %223 : vector<8x1xf32> to vector<8x32xf32>
      %229 = arith.subf %214, %228 : vector<8x32xf32>
      %cst_79 = arith.constant 9.99999996E-13 : f32
      %230 = vector.broadcast %cst_79 : f32 to vector<8x1xf32>
      %231 = arith.addf %227, %230 : vector<8x1xf32>
      %232 = math.rsqrt %231 : vector<8x1xf32>
      %233 = vector.broadcast %232 : vector<8x1xf32> to vector<8x32xf32>
      %234 = arith.mulf %229, %233 : vector<8x32xf32>
      %235 = vector.broadcast %215 : vector<1x32xf32> to vector<8x32xf32>
      %236 = arith.mulf %234, %235 : vector<8x32xf32>
      %237 = vector.broadcast %216 : vector<1x32xf32> to vector<8x32xf32>
      %238 = arith.addf %236, %237 : vector<8x32xf32>
      %239 = vector.shape_cast %238 : vector<8x32xf32> to vector<1x8x32xf32>
      %240 = arith.index_cast %arg2 : i32 to index
      %c0_80 = arith.constant 0 : index
      %c0_81 = arith.constant 0 : index
      %c0_82 = arith.constant 0 : index
      %241 = vector.load %arg14[%240, %c0_80, %c0_81, %c0_82] : memref<1x1x8x32xf32, #tpu.memory_space<vmem>>, vector<1x1x8x32xf32>
      %242 = vector.shape_cast %241 : vector<1x1x8x32xf32> to vector<1x8x32xf32>
      %243 = vector.shape_cast %239 : vector<1x8x32xf32> to vector<1x1x8x32xf32>
      tpu.vector_store %arg14[%240, %c0_80, %c0_81, %c0_82], %243 {strides = array<i32>} : memref<1x1x8x32xf32, #tpu.memory_space<vmem>>, vector<1x1x8x32xf32>,
    } else {
    }
    %c0_3 = arith.constant 0 : index
    %c0_4 = arith.constant 0 : index
    %c0_5 = arith.constant 0 : index
    %13 = vector.load %arg4[%c0_3, %c0_4, %c0_5] : memref<1x1x1xi32, #tpu.memory_space<vmem>>, vector<1x1x1xi32>
    %14 = vector.shape_cast %13 : vector<1x1x1xi32> to vector<1x1xi32>
    %15 = tpu.iota {dimensions = array<i32: 1>} : vector<1x8xi32>
    %16 = vector.broadcast %14 : vector<1x1xi32> to vector<1x8xi32>
    %17 = arith.cmpi slt, %15, %16 : vector<1x8xi32>
    %18 = vector.shape_cast %17 : vector<1x8xi1> to vector<1x1x8xi1>
    %19 = arith.index_cast %arg2 : i32 to index
    %c0_6 = arith.constant 0 : index
    %c0_7 = arith.constant 0 : index
    %c0_8 = arith.constant 0 : index
    %20 = vector.load %arg14[%19, %c0_6, %c0_7, %c0_8] : memref<1x1x8x32xf32, #tpu.memory_space<vmem>>, vector<1x1x8x32xf32>
    %21 = vector.shape_cast %20 : vector<1x1x8x32xf32> to vector<1x8x32xf32>
    %22 = vector.shape_cast %21 : vector<1x8x32xf32> to vector<8x32xf32>
    %23 = arith.truncf %22 : vector<8x32xf32> to vector<8x32xbf16>
    %c0_9 = arith.constant 0 : index
    %c0_10 = arith.constant 0 : index
    %c0_11 = arith.constant 0 : index
    %24 = vector.load %arg6[%c0_9, %c0_10, %c0_11] : memref<1x32x96xbf16, #tpu.memory_space<vmem>>, vector<1x32x96xbf16>
    %25 = vector.shape_cast %24 : vector<1x32x96xbf16> to vector<32x96xbf16>
    %cst = arith.constant dense<0.000000e+00> : vector<8x96xf32>
    %26 = tpu.matmul %23, %25, %cst {dimension_numbers = #tpu.dot_dimension_numbers<[1], [0], [0], [1], [0, 0, 1, 1], [], []>} : vector<8x32xbf16>, vector<32x96xbf16>, vector<8x96xf32> -> vector<8x96xf32>
    %27 = vector.broadcast %2 : vector<1x96xf32> to vector<8x96xf32>
    %28 = arith.addf %26, %27 : vector<8x96xf32>
    %29 = vector.extract_strided_slice %28 {offsets = [0, 0], sizes = [8, 32], strides = [1, 1]} : vector<8x96xf32> to vector<8x32xf32>
    %30 = arith.truncf %29 : vector<8x32xf32> to vector<8x32xbf16>
    %31 = vector.shape_cast %30 : vector<8x32xbf16> to vector<1x8x32xbf16>
    %32 = vector.extract_strided_slice %28 {offsets = [0, 32], sizes = [8, 32], strides = [1, 1]} : vector<8x96xf32> to vector<8x32xf32>
    %33 = arith.truncf %32 : vector<8x32xf32> to vector<8x32xbf16>
    %34 = vector.shape_cast %33 : vector<8x32xbf16> to vector<1x8x32xbf16>
    %35 = vector.extract_strided_slice %28 {offsets = [0, 64], sizes = [8, 32], strides = [1, 1]} : vector<8x96xf32> to vector<8x32xf32>
    %36 = arith.truncf %35 : vector<8x32xf32> to vector<8x32xbf16>
    %37 = vector.shape_cast %36 : vector<8x32xbf16> to vector<1x8x32xbf16>
    %38 = vector.extract_strided_slice %31 {offsets = [0, 0, 0], sizes = [1, 8, 8], strides = [1, 1, 1]} : vector<1x8x32xbf16> to vector<1x8x8xbf16>
    %39 = vector.extract_strided_slice %34 {offsets = [0, 0, 0], sizes = [1, 8, 8], strides = [1, 1, 1]} : vector<1x8x32xbf16> to vector<1x8x8xbf16>
    %40 = vector.extract_strided_slice %37 {offsets = [0, 0, 0], sizes = [1, 8, 8], strides = [1, 1, 1]} : vector<1x8x32xbf16> to vector<1x8x8xbf16>
    "tpu.trace_start"() <{level = 10 : i32, message = "bqd,bkd->bqk"}> : () -> ()
    %cst_12 = arith.constant dense<0.000000e+00> : vector<1x8x8xf32>
    %41 = tpu.matmul %38, %39, %cst_12 {dimension_numbers = #tpu.dot_dimension_numbers<[2], [2], [1], [1], [0, 0, 0, 1, 1, 1], [0], [0]>} : vector<1x8x8xbf16>, vector<1x8x8xbf16>, vector<1x8x8xf32> -> vector<1x8x8xf32>
    %cst_13 = arith.constant -3.40282347E+38 : f32
    "tpu.trace_stop"() : () -> ()
    %42 = vector.shape_cast %18 : vector<1x1x8xi1> to vector<1x1x8xi1>
    %43 = vector.broadcast %42 : vector<1x1x8xi1> to vector<1x8x8xi1>
    %44 = vector.broadcast %cst_13 : f32 to vector<1x8x8xf32>
    %45 = arith.select %43, %41, %44 : vector<1x8x8xi1>, vector<1x8x8xf32>
    %cst_14 = arith.constant dense<0xFF800000> : vector<1x8xf32>
    %46 = vector.multi_reduction <maximumf>, %45, %cst_14 [2] : vector<1x8x8xf32> to vector<1x8xf32>
    %47 = vector.shape_cast %46 : vector<1x8xf32> to vector<1x8x1xf32>
    %48 = vector.broadcast %47 : vector<1x8x1xf32> to vector<1x8x8xf32>
    %49 = arith.subf %45, %48 : vector<1x8x8xf32>
    %50 = math.exp %49 : vector<1x8x8xf32>
    %cst_15 = arith.constant dense<0.000000e+00> : vector<1x8xf32>
    %51 = vector.multi_reduction <add>, %50, %cst_15 [2] : vector<1x8x8xf32> to vector<1x8xf32>
    %52 = vector.shape_cast %51 : vector<1x8xf32> to vector<1x8x1xf32>
    %53 = tpu.reciprocal %52 {approx = true} : vector<1x8x1xf32> -> vector<1x8x1xf32>
    %54 = vector.broadcast %53 : vector<1x8x1xf32> to vector<1x8x8xf32>
    %55 = arith.mulf %50, %54 : vector<1x8x8xf32>
    %56 = arith.truncf %55 : vector<1x8x8xf32> to vector<1x8x8xbf16>
    "tpu.trace_start"() <{level = 10 : i32, message = "bqk,bkd->bqd"}> : () -> ()
    %cst_16 = arith.constant dense<0.000000e+00> : vector<1x8x8xf32>
    %57 = tpu.matmul %56, %40, %cst_16 {dimension_numbers = #tpu.dot_dimension_numbers<[2], [1], [1], [2], [0, 0, 0, 1, 1, 2], [0], [0]>} : vector<1x8x8xbf16>, vector<1x8x8xbf16>, vector<1x8x8xf32> -> vector<1x8x8xf32>
    "tpu.trace_stop"() : () -> ()
    %58 = vector.extract_strided_slice %31 {offsets = [0, 0, 8], sizes = [1, 8, 8], strides = [1, 1, 1]} : vector<1x8x32xbf16> to vector<1x8x8xbf16>
    %59 = vector.extract_strided_slice %34 {offsets = [0, 0, 8], sizes = [1, 8, 8], strides = [1, 1, 1]} : vector<1x8x32xbf16> to vector<1x8x8xbf16>
    %60 = vector.extract_strided_slice %37 {offsets = [0, 0, 8], sizes = [1, 8, 8], strides = [1, 1, 1]} : vector<1x8x32xbf16> to vector<1x8x8xbf16>
    "tpu.trace_start"() <{level = 10 : i32, message = "bqd,bkd->bqk"}> : () -> ()
    %cst_17 = arith.constant dense<0.000000e+00> : vector<1x8x8xf32>
    %61 = tpu.matmul %58, %59, %cst_17 {dimension_numbers = #tpu.dot_dimension_numbers<[2], [2], [1], [1], [0, 0, 0, 1, 1, 1], [0], [0]>} : vector<1x8x8xbf16>, vector<1x8x8xbf16>, vector<1x8x8xf32> -> vector<1x8x8xf32>
    %cst_18 = arith.constant -3.40282347E+38 : f32
    "tpu.trace_stop"() : () -> ()
    %62 = vector.shape_cast %18 : vector<1x1x8xi1> to vector<1x1x8xi1>
    %63 = vector.broadcast %62 : vector<1x1x8xi1> to vector<1x8x8xi1>
    %64 = vector.broadcast %cst_18 : f32 to vector<1x8x8xf32>
    %65 = arith.select %63, %61, %64 : vector<1x8x8xi1>, vector<1x8x8xf32>
    %cst_19 = arith.constant dense<0xFF800000> : vector<1x8xf32>
    %66 = vector.multi_reduction <maximumf>, %65, %cst_19 [2] : vector<1x8x8xf32> to vector<1x8xf32>
    %67 = vector.shape_cast %66 : vector<1x8xf32> to vector<1x8x1xf32>
    %68 = vector.broadcast %67 : vector<1x8x1xf32> to vector<1x8x8xf32>
    %69 = arith.subf %65, %68 : vector<1x8x8xf32>
    %70 = math.exp %69 : vector<1x8x8xf32>
    %cst_20 = arith.constant dense<0.000000e+00> : vector<1x8xf32>
    %71 = vector.multi_reduction <add>, %70, %cst_20 [2] : vector<1x8x8xf32> to vector<1x8xf32>
    %72 = vector.shape_cast %71 : vector<1x8xf32> to vector<1x8x1xf32>
    %73 = tpu.reciprocal %72 {approx = true} : vector<1x8x1xf32> -> vector<1x8x1xf32>
    %74 = vector.broadcast %73 : vector<1x8x1xf32> to vector<1x8x8xf32>
    %75 = arith.mulf %70, %74 : vector<1x8x8xf32>
    %76 = arith.truncf %75 : vector<1x8x8xf32> to vector<1x8x8xbf16>
    "tpu.trace_start"() <{level = 10 : i32, message = "bqk,bkd->bqd"}> : () -> ()
    %cst_21 = arith.constant dense<0.000000e+00> : vector<1x8x8xf32>
    %77 = tpu.matmul %76, %60, %cst_21 {dimension_numbers = #tpu.dot_dimension_numbers<[2], [1], [1], [2], [0, 0, 0, 1, 1, 2], [0], [0]>} : vector<1x8x8xbf16>, vector<1x8x8xbf16>, vector<1x8x8xf32> -> vector<1x8x8xf32>
    "tpu.trace_stop"() : () -> ()
    %78 = vector.extract_strided_slice %31 {offsets = [0, 0, 16], sizes = [1, 8, 8], strides = [1, 1, 1]} : vector<1x8x32xbf16> to vector<1x8x8xbf16>
    %79 = vector.extract_strided_slice %34 {offsets = [0, 0, 16], sizes = [1, 8, 8], strides = [1, 1, 1]} : vector<1x8x32xbf16> to vector<1x8x8xbf16>
    %80 = vector.extract_strided_slice %37 {offsets = [0, 0, 16], sizes = [1, 8, 8], strides = [1, 1, 1]} : vector<1x8x32xbf16> to vector<1x8x8xbf16>
    "tpu.trace_start"() <{level = 10 : i32, message = "bqd,bkd->bqk"}> : () -> ()
    %cst_22 = arith.constant dense<0.000000e+00> : vector<1x8x8xf32>
    %81 = tpu.matmul %78, %79, %cst_22 {dimension_numbers = #tpu.dot_dimension_numbers<[2], [2], [1], [1], [0, 0, 0, 1, 1, 1], [0], [0]>} : vector<1x8x8xbf16>, vector<1x8x8xbf16>, vector<1x8x8xf32> -> vector<1x8x8xf32>
    %cst_23 = arith.constant -3.40282347E+38 : f32
    "tpu.trace_stop"() : () -> ()
    %82 = vector.shape_cast %18 : vector<1x1x8xi1> to vector<1x1x8xi1>
    %83 = vector.broadcast %82 : vector<1x1x8xi1> to vector<1x8x8xi1>
    %84 = vector.broadcast %cst_23 : f32 to vector<1x8x8xf32>
    %85 = arith.select %83, %81, %84 : vector<1x8x8xi1>, vector<1x8x8xf32>
    %cst_24 = arith.constant dense<0xFF800000> : vector<1x8xf32>
    %86 = vector.multi_reduction <maximumf>, %85, %cst_24 [2] : vector<1x8x8xf32> to vector<1x8xf32>
    %87 = vector.shape_cast %86 : vector<1x8xf32> to vector<1x8x1xf32>
    %88 = vector.broadcast %87 : vector<1x8x1xf32> to vector<1x8x8xf32>
    %89 = arith.subf %85, %88 : vector<1x8x8xf32>
    %90 = math.exp %89 : vector<1x8x8xf32>
    %cst_25 = arith.constant dense<0.000000e+00> : vector<1x8xf32>
    %91 = vector.multi_reduction <add>, %90, %cst_25 [2] : vector<1x8x8xf32> to vector<1x8xf32>
    %92 = vector.shape_cast %91 : vector<1x8xf32> to vector<1x8x1xf32>
    %93 = tpu.reciprocal %92 {approx = true} : vector<1x8x1xf32> -> vector<1x8x1xf32>
    %94 = vector.broadcast %93 : vector<1x8x1xf32> to vector<1x8x8xf32>
    %95 = arith.mulf %90, %94 : vector<1x8x8xf32>
    %96 = arith.truncf %95 : vector<1x8x8xf32> to vector<1x8x8xbf16>
    "tpu.trace_start"() <{level = 10 : i32, message = "bqk,bkd->bqd"}> : () -> ()
    %cst_26 = arith.constant dense<0.000000e+00> : vector<1x8x8xf32>
    %97 = tpu.matmul %96, %80, %cst_26 {dimension_numbers = #tpu.dot_dimension_numbers<[2], [1], [1], [2], [0, 0, 0, 1, 1, 2], [0], [0]>} : vector<1x8x8xbf16>, vector<1x8x8xbf16>, vector<1x8x8xf32> -> vector<1x8x8xf32>
    "tpu.trace_stop"() : () -> ()
    %98 = vector.extract_strided_slice %31 {offsets = [0, 0, 24], sizes = [1, 8, 8], strides = [1, 1, 1]} : vector<1x8x32xbf16> to vector<1x8x8xbf16>
    %99 = vector.extract_strided_slice %34 {offsets = [0, 0, 24], sizes = [1, 8, 8], strides = [1, 1, 1]} : vector<1x8x32xbf16> to vector<1x8x8xbf16>
    %100 = vector.extract_strided_slice %37 {offsets = [0, 0, 24], sizes = [1, 8, 8], strides = [1, 1, 1]} : vector<1x8x32xbf16> to vector<1x8x8xbf16>
    "tpu.trace_start"() <{level = 10 : i32, message = "bqd,bkd->bqk"}> : () -> ()
    %cst_27 = arith.constant dense<0.000000e+00> : vector<1x8x8xf32>
    %101 = tpu.matmul %98, %99, %cst_27 {dimension_numbers = #tpu.dot_dimension_numbers<[2], [2], [1], [1], [0, 0, 0, 1, 1, 1], [0], [0]>} : vector<1x8x8xbf16>, vector<1x8x8xbf16>, vector<1x8x8xf32> -> vector<1x8x8xf32>
    %cst_28 = arith.constant -3.40282347E+38 : f32
    "tpu.trace_stop"() : () -> ()
    %102 = vector.shape_cast %18 : vector<1x1x8xi1> to vector<1x1x8xi1>
    %103 = vector.broadcast %102 : vector<1x1x8xi1> to vector<1x8x8xi1>
    %104 = vector.broadcast %cst_28 : f32 to vector<1x8x8xf32>
    %105 = arith.select %103, %101, %104 : vector<1x8x8xi1>, vector<1x8x8xf32>
    %cst_29 = arith.constant dense<0xFF800000> : vector<1x8xf32>
    %106 = vector.multi_reduction <maximumf>, %105, %cst_29 [2] : vector<1x8x8xf32> to vector<1x8xf32>
    %107 = vector.shape_cast %106 : vector<1x8xf32> to vector<1x8x1xf32>
    %108 = vector.broadcast %107 : vector<1x8x1xf32> to vector<1x8x8xf32>
    %109 = arith.subf %105, %108 : vector<1x8x8xf32>
    %110 = math.exp %109 : vector<1x8x8xf32>
    %cst_30 = arith.constant dense<0.000000e+00> : vector<1x8xf32>
    %111 = vector.multi_reduction <add>, %110, %cst_30 [2] : vector<1x8x8xf32> to vector<1x8xf32>
    %112 = vector.shape_cast %111 : vector<1x8xf32> to vector<1x8x1xf32>
    %113 = tpu.reciprocal %112 {approx = true} : vector<1x8x1xf32> -> vector<1x8x1xf32>
    %114 = vector.broadcast %113 : vector<1x8x1xf32> to vector<1x8x8xf32>
    %115 = arith.mulf %110, %114 : vector<1x8x8xf32>
    %116 = arith.truncf %115 : vector<1x8x8xf32> to vector<1x8x8xbf16>
    "tpu.trace_start"() <{level = 10 : i32, message = "bqk,bkd->bqd"}> : () -> ()
    %cst_31 = arith.constant dense<0.000000e+00> : vector<1x8x8xf32>
    %117 = tpu.matmul %116, %100, %cst_31 {dimension_numbers = #tpu.dot_dimension_numbers<[2], [1], [1], [2], [0, 0, 0, 1, 1, 2], [0], [0]>} : vector<1x8x8xbf16>, vector<1x8x8xbf16>, vector<1x8x8xf32> -> vector<1x8x8xf32>
    "tpu.trace_stop"() : () -> ()
    %118 = tpu.concatenate %57, %77, %97, %117 in 2 : vector<1x8x8xf32>, vector<1x8x8xf32>, vector<1x8x8xf32>, vector<1x8x8xf32> -> vector<1x8x32xf32>
    %119 = vector.shape_cast %118 : vector<1x8x32xf32> to vector<8x32xf32>
    %120 = arith.truncf %119 : vector<8x32xf32> to vector<8x32xbf16>
    %c0_32 = arith.constant 0 : index
    %c0_33 = arith.constant 0 : index
    %c0_34 = arith.constant 0 : index
    %121 = vector.load %arg7[%c0_32, %c0_33, %c0_34] : memref<1x32x32xbf16, #tpu.memory_space<vmem>>, vector<1x32x32xbf16>
    %122 = vector.shape_cast %121 : vector<1x32x32xbf16> to vector<32x32xbf16>
    %cst_35 = arith.constant dense<0.000000e+00> : vector<8x32xf32>
    %123 = tpu.matmul %120, %122, %cst_35 {dimension_numbers = #tpu.dot_dimension_numbers<[1], [0], [0], [1], [0, 0, 1, 1], [], []>} : vector<8x32xbf16>, vector<32x32xbf16>, vector<8x32xf32> -> vector<8x32xf32>
    %124 = vector.broadcast %3 : vector<1x32xf32> to vector<8x32xf32>
    %125 = arith.addf %123, %124 : vector<8x32xf32>
    %126 = vector.shape_cast %21 : vector<1x8x32xf32> to vector<8x32xf32>
    %127 = arith.addf %126, %125 : vector<8x32xf32>
    %cst_36 = arith.constant dense<0.000000e+00> : vector<8xf32>
    %128 = vector.multi_reduction <add>, %127, %cst_36 [1] : vector<8x32xf32> to vector<8xf32>
    %129 = vector.shape_cast %128 : vector<8xf32> to vector<8x1xf32>
    %130 = arith.mulf %127, %127 : vector<8x32xf32>
    %cst_37 = arith.constant dense<0.000000e+00> : vector<8xf32>
    %131 = vector.multi_reduction <add>, %130, %cst_37 [1] : vector<8x32xf32> to vector<8xf32>
    %132 = vector.shape_cast %131 : vector<8xf32> to vector<8x1xf32>
    %cst_38 = arith.constant 3.125000e-02 : f32
    %133 = vector.broadcast %cst_38 : f32 to vector<8x1xf32>
    %134 = arith.mulf %129, %133 : vector<8x1xf32>
    %cst_39 = arith.constant 3.125000e-02 : f32
    %135 = vector.broadcast %cst_39 : f32 to vector<8x1xf32>
    %136 = arith.mulf %132, %135 : vector<8x1xf32>
    %137 = arith.mulf %134, %134 : vector<8x1xf32>
    %138 = arith.subf %136, %137 : vector<8x1xf32>
    %139 = vector.broadcast %134 : vector<8x1xf32> to vector<8x32xf32>
    %140 = arith.subf %127, %139 : vector<8x32xf32>
    %cst_40 = arith.constant 9.99999996E-13 : f32
    %141 = vector.broadcast %cst_40 : f32 to vector<8x1xf32>
    %142 = arith.addf %138, %141 : vector<8x1xf32>
    %143 = math.rsqrt %142 : vector<8x1xf32>
    %144 = vector.broadcast %143 : vector<8x1xf32> to vector<8x32xf32>
    %145 = arith.mulf %140, %144 : vector<8x32xf32>
    %146 = vector.broadcast %4 : vector<1x32xf32> to vector<8x32xf32>
    %147 = arith.mulf %145, %146 : vector<8x32xf32>
    %148 = vector.broadcast %5 : vector<1x32xf32> to vector<8x32xf32>
    %149 = arith.addf %147, %148 : vector<8x32xf32>
    %150 = arith.truncf %149 : vector<8x32xf32> to vector<8x32xbf16>
    %c0_41 = arith.constant 0 : index
    %c0_42 = arith.constant 0 : index
    %c0_43 = arith.constant 0 : index
    %151 = vector.load %arg8[%c0_41, %c0_42, %c0_43] : memref<1x32x64xbf16, #tpu.memory_space<vmem>>, vector<1x32x64xbf16>
    %152 = vector.shape_cast %151 : vector<1x32x64xbf16> to vector<32x64xbf16>
    %cst_44 = arith.constant dense<0.000000e+00> : vector<8x64xf32>
    %153 = tpu.matmul %150, %152, %cst_44 {dimension_numbers = #tpu.dot_dimension_numbers<[1], [0], [0], [1], [0, 0, 1, 1], [], []>} : vector<8x32xbf16>, vector<32x64xbf16>, vector<8x64xf32> -> vector<8x64xf32>
    %154 = vector.broadcast %6 : vector<1x64xf32> to vector<8x64xf32>
    %155 = arith.addf %153, %154 : vector<8x64xf32>
    %156 = arith.mulf %155, %155 : vector<8x64xf32>
    %157 = arith.mulf %155, %156 : vector<8x64xf32>
    %cst_45 = arith.constant 4.471500e-02 : f32
    %158 = vector.broadcast %cst_45 : f32 to vector<8x64xf32>
    %159 = arith.mulf %158, %157 : vector<8x64xf32>
    %160 = arith.addf %155, %159 : vector<8x64xf32>
    %cst_46 = arith.constant 0.797884583 : f32
    %161 = vector.broadcast %cst_46 : f32 to vector<8x64xf32>
    %162 = arith.mulf %161, %160 : vector<8x64xf32>
    %163 = math.tanh %162 : vector<8x64xf32>
    %cst_47 = arith.constant 1.000000e+00 : f32
    %164 = vector.broadcast %cst_47 : f32 to vector<8x64xf32>
    %165 = arith.addf %164, %163 : vector<8x64xf32>
    %cst_48 = arith.constant 5.000000e-01 : f32
    %166 = vector.broadcast %cst_48 : f32 to vector<8x64xf32>
    %167 = arith.mulf %166, %165 : vector<8x64xf32>
    %168 = arith.mulf %155, %167 : vector<8x64xf32>
    %169 = arith.truncf %168 : vector<8x64xf32> to vector<8x64xbf16>
    %c0_49 = arith.constant 0 : index
    %c0_50 = arith.constant 0 : index
    %c0_51 = arith.constant 0 : index
    %170 = vector.load %arg9[%c0_49, %c0_50, %c0_51] : memref<1x64x32xbf16, #tpu.memory_space<vmem>>, vector<1x64x32xbf16>
    %171 = vector.shape_cast %170 : vector<1x64x32xbf16> to vector<64x32xbf16>
    %cst_52 = arith.constant dense<0.000000e+00> : vector<8x32xf32>
    %172 = tpu.matmul %169, %171, %cst_52 {dimension_numbers = #tpu.dot_dimension_numbers<[1], [0], [0], [1], [0, 0, 1, 1], [], []>} : vector<8x64xbf16>, vector<64x32xbf16>, vector<8x32xf32> -> vector<8x32xf32>
    %173 = vector.broadcast %7 : vector<1x32xf32> to vector<8x32xf32>
    %174 = arith.addf %172, %173 : vector<8x32xf32>
    %175 = arith.addf %149, %174 : vector<8x32xf32>
    %cst_53 = arith.constant dense<0.000000e+00> : vector<8xf32>
    %176 = vector.multi_reduction <add>, %175, %cst_53 [1] : vector<8x32xf32> to vector<8xf32>
    %177 = vector.shape_cast %176 : vector<8xf32> to vector<8x1xf32>
    %178 = arith.mulf %175, %175 : vector<8x32xf32>
    %cst_54 = arith.constant dense<0.000000e+00> : vector<8xf32>
    %179 = vector.multi_reduction <add>, %178, %cst_54 [1] : vector<8x32xf32> to vector<8xf32>
    %180 = vector.shape_cast %179 : vector<8xf32> to vector<8x1xf32>
    %cst_55 = arith.constant 3.125000e-02 : f32
    %181 = vector.broadcast %cst_55 : f32 to vector<8x1xf32>
    %182 = arith.mulf %177, %181 : vector<8x1xf32>
    %cst_56 = arith.constant 3.125000e-02 : f32
    %183 = vector.broadcast %cst_56 : f32 to vector<8x1xf32>
    %184 = arith.mulf %180, %183 : vector<8x1xf32>
    %185 = arith.mulf %182, %182 : vector<8x1xf32>
    %186 = arith.subf %184, %185 : vector<8x1xf32>
    %187 = vector.broadcast %182 : vector<8x1xf32> to vector<8x32xf32>
    %188 = arith.subf %175, %187 : vector<8x32xf32>
    %cst_57 = arith.constant 9.99999996E-13 : f32
    %189 = vector.broadcast %cst_57 : f32 to vector<8x1xf32>
    %190 = arith.addf %186, %189 : vector<8x1xf32>
    %191 = math.rsqrt %190 : vector<8x1xf32>
    %192 = vector.broadcast %191 : vector<8x1xf32> to vector<8x32xf32>
    %193 = arith.mulf %188, %192 : vector<8x32xf32>
    %194 = vector.broadcast %8 : vector<1x32xf32> to vector<8x32xf32>
    %195 = arith.mulf %193, %194 : vector<8x32xf32>
    %196 = vector.broadcast %9 : vector<1x32xf32> to vector<8x32xf32>
    %197 = arith.addf %195, %196 : vector<8x32xf32>
    %198 = vector.shape_cast %197 : vector<8x32xf32> to vector<1x8x32xf32>
    %199 = arith.index_cast %arg2 : i32 to index
    %c0_58 = arith.constant 0 : index
    %c0_59 = arith.constant 0 : index
    %c0_60 = arith.constant 0 : index
    %200 = vector.load %arg14[%199, %c0_58, %c0_59, %c0_60] : memref<1x1x8x32xf32, #tpu.memory_space<vmem>>, vector<1x1x8x32xf32>
    %201 = vector.shape_cast %200 : vector<1x1x8x32xf32> to vector<1x8x32xf32>
    %202 = vector.shape_cast %198 : vector<1x8x32xf32> to vector<1x1x8x32xf32>
    tpu.vector_store %arg14[%199, %c0_58, %c0_59, %c0_60], %202 {strides = array<i32>} : memref<1x1x8x32xf32, #tpu.memory_space<vmem>>, vector<1x1x8x32xf32>,
    %203 = vector.extract_strided_slice %198 {offsets = [0, 0, 0], sizes = [1, 1, 32], strides = [1, 1, 1]} : vector<1x8x32xf32> to vector<1x1x32xf32>
    %204 = vector.shape_cast %203 : vector<1x1x32xf32> to vector<1x32xf32>
    %205 = arith.truncf %204 : vector<1x32xf32> to vector<1x32xbf16>
    %c0_61 = arith.constant 0 : index
    %c0_62 = arith.constant 0 : index
    %206 = vector.load %arg11[%c0_61, %c0_62] : memref<32x128xbf16, #tpu.memory_space<vmem>>, vector<32x128xbf16>
    %cst_63 = arith.constant dense<0.000000e+00> : vector<1x128xf32>
    %207 = tpu.matmul %205, %206, %cst_63 {dimension_numbers = #tpu.dot_dimension_numbers<[1], [0], [0], [1], [0, 0, 1, 1], [], []>} : vector<1x32xbf16>, vector<32x128xbf16>, vector<1x128xf32> -> vector<1x128xf32>
    %c0_64 = arith.constant 0 : index
    %c0_65 = arith.constant 0 : index
    %208 = vector.load %arg12[%c0_64, %c0_65] : memref<1x128xf32, #tpu.memory_space<vmem>>, vector<1x128xf32>
    %209 = arith.addf %207, %208 : vector<1x128xf32>
    %210 = vector.shape_cast %209 : vector<1x128xf32> to vector<1x1x128xf32>
    %c0_66 = arith.constant 0 : index
    %c0_67 = arith.constant 0 : index
    %c0_68 = arith.constant 0 : index
    %211 = vector.load %arg13[%c0_66, %c0_67, %c0_68] : memref<1x1x128xf32, #tpu.memory_space<vmem>>, vector<1x1x128xf32>
    tpu.vector_store %arg13[%c0_66, %c0_67, %c0_68], %210 {strides = array<i32>} : memref<1x1x128xf32, #tpu.memory_space<vmem>>, vector<1x1x128xf32>,
    return
  }
  func.func @transform_0(%arg0: i32, %arg1: i32, %arg2: i32) -> (i32, i32, i32) {
    %c1_i32 = arith.constant 1 : i32
    %0 = arith.muli %arg0, %c1_i32 : i32
    %1 = arith.addi %0, %arg2 : i32
    %c0_i32 = arith.constant 0 : i32
    %c0_i32_0 = arith.constant 0 : i32
    %c0_i32_1 = arith.constant 0 : i32
    return %1, %c0_i32, %c0_i32_0 : i32, i32, i32
  }
  func.func @transform_1(%arg0: i32, %arg1: i32, %arg2: i32) -> (i32, i32, i32) {
    %c1_i32 = arith.constant 1 : i32
    %0 = arith.muli %arg0, %c1_i32 : i32
    %1 = arith.addi %0, %arg2 : i32
    %c0_i32 = arith.constant 0 : i32
    %c0_i32_0 = arith.constant 0 : i32
    %c0_i32_1 = arith.constant 0 : i32
    return %1, %c0_i32, %c0_i32_0 : i32, i32, i32
  }
  func.func @transform_2(%arg0: i32, %arg1: i32, %arg2: i32) -> (i32, i32) {
    %c0_i32 = arith.constant 0 : i32
    %c0_i32_0 = arith.constant 0 : i32
    %c0_i32_1 = arith.constant 0 : i32
    return %c0_i32, %c0_i32_0 : i32, i32
  }
  func.func @transform_3(%arg0: i32, %arg1: i32, %arg2: i32) -> (i32, i32, i32) {
    %c0_i32 = arith.constant 0 : i32
    %c0_i32_0 = arith.constant 0 : i32
    %c0_i32_1 = arith.constant 0 : i32
    return %arg1, %c0_i32, %c0_i32_0 : i32, i32, i32
  }
  func.func @transform_4(%arg0: i32, %arg1: i32, %arg2: i32) -> (i32, i32, i32) {
    %c0_i32 = arith.constant 0 : i32
    %c0_i32_0 = arith.constant 0 : i32
    %c0_i32_1 = arith.constant 0 : i32
    return %arg1, %c0_i32, %c0_i32_0 : i32, i32, i32
  }
  func.func @transform_5(%arg0: i32, %arg1: i32, %arg2: i32) -> (i32, i32, i32) {
    %c0_i32 = arith.constant 0 : i32
    %c0_i32_0 = arith.constant 0 : i32
    %c0_i32_1 = arith.constant 0 : i32
    return %arg1, %c0_i32, %c0_i32_0 : i32, i32, i32
  }
  func.func @transform_6(%arg0: i32, %arg1: i32, %arg2: i32) -> (i32, i32, i32) {
    %c0_i32 = arith.constant 0 : i32
    %c0_i32_0 = arith.constant 0 : i32
    %c0_i32_1 = arith.constant 0 : i32
    return %arg1, %c0_i32, %c0_i32_0 : i32, i32, i32
  }
  func.func @transform_7(%arg0: i32, %arg1: i32, %arg2: i32) -> (i32, i32, i32) {
    %c0_i32 = arith.constant 0 : i32
    %c0_i32_0 = arith.constant 0 : i32
    %c0_i32_1 = arith.constant 0 : i32
    return %arg1, %c0_i32, %c0_i32_0 : i32, i32, i32
  }
  func.func @transform_8(%arg0: i32, %arg1: i32, %arg2: i32) -> (i32, i32) {
    %c0_i32 = arith.constant 0 : i32
    %c0_i32_0 = arith.constant 0 : i32
    %c0_i32_1 = arith.constant 0 : i32
    return %c0_i32, %c0_i32_0 : i32, i32
  }
  func.func @transform_9(%arg0: i32, %arg1: i32, %arg2: i32) -> (i32, i32) {
    %c0_i32 = arith.constant 0 : i32
    %c0_i32_0 = arith.constant 0 : i32
    %c0_i32_1 = arith.constant 0 : i32
    return %c0_i32, %c0_i32_0 : i32, i32
  }
  func.func @transform_10(%arg0: i32, %arg1: i32, %arg2: i32) -> (i32, i32, i32) {
    %c1_i32 = arith.constant 1 : i32
    %0 = arith.muli %arg0, %c1_i32 : i32
    %1 = arith.addi %0, %arg2 : i32
    %c0_i32 = arith.constant 0 : i32
    %c0_i32_0 = arith.constant 0 : i32
    %c0_i32_1 = arith.constant 0 : i32
    return %1, %c0_i32, %c0_i32_0 : i32, i32, i32
  }
}

</mosaic_0001>

<bundles_post_ra>
// kernel: bert_classifier_forward.1
= control target key start
LH: loop header
LB: loop body
LE: loop exit
PB: predicated region body
PF: predicated region fallthrough
CT: control target
= control target key end

     0   :  { %s2370_s0 = inlined_call_operand.vmem [shape: bf16[2,8,32], index: 0, kind: input, shape index: {}]   ;;  %s2371_s1 = inlined_call_operand.vmem [shape: s32[2,1,1], index: 1, kind: input, shape index: {}]   ;;  %s2372_s2 = inlined_call_operand.vmem [shape: f32[2,32], index: 2, kind: input, shape index: {}]   ;;  %s2373_s3 = inlined_call_operand.vmem [shape: bf16[2,32,96], index: 3, kind: input, shape index: {}]   ;;  %s2374_s4 = inlined_call_operand.vmem [shape: bf16[2,32,32], index: 4, kind: input, shape index: {}]   ;;  %s2375_s5 = inlined_call_operand.vmem [shape: bf16[2,32,64], index: 5, kind: input, shape index: {}]   ;;  %s2376_s6 = inlined_call_operand.vmem [shape: bf16[2,64,32], index: 6, kind: input, shape index: {}]   ;;  %s2377_s7 = inlined_call_operand.vmem [shape: f32[2,8,96], index: 7, kind: input, shape index: {}]   ;;  %s2378_s8 = inlined_call_operand.vmem [shape: bf16[32,128], index: 8, kind: input, shape index: {}]   ;;  %s2379_s9 = inlined_call_operand.vmem [shape: f32[1,128], index: 9, kind: input, shape index: {}]   ;;  %s2380_s10 = inlined_call_operand.hbm [shape: f32[2,1,128], index: 10, kind: output, shape index: {}]  }
   0x1   :  { %2390 = sst [smem:[#allocation15_spill]] %s2370_s0 }
   0x2   :  { %2391 = sst [smem:[#allocation16_spill]] %s2379_s9 }
   0x3   :  { %2392 = sst [smem:[#allocation17_spill]] %s2380_s10 }
   0x4   :  { %15 = vsyncpa [#allocation4], 0 }
   0x5   :  { %17 = vsyncpa [#allocation4 + $0x1], 0  ;;  %s2042_s13 = smov 0   ;;  %s2044_s14 = smov 0  }
   0x6   :  { %s2046_s15 = smov 0   ;;  %s2048_s16 = smov 0  }
   0x7   :  { %s2050_s17 = smov 0   ;;  %s2052_s18 = smov 0  }
   0x8   :  { %s2054_s19 = smov 0   ;;  %s2056_s20 = smov 0  }
   0x9 LB: > { %2393 = sst [smem:[#allocation6_spill]] %s1939_s13  ;;  %s1574_s21 = sadd.s32 4294967295, %s1967_s20   ;;  %s1967_s20 = sphi %s2056_s20, %s23_s20   ;;  %s1963_s19 = sphi %s2054_s19, %s2418_s19   ;;  %s1959_s18 = sphi %s2052_s18, %s2417_s18   ;;  %s1955_s17 = sphi %s2050_s17, %s2416_s17   ;;  %s1951_s16 = sphi %s2048_s16, %s2415_s16   ;;  %s1947_s15 = sphi %s2046_s15, %s2414_s15   ;;  %s1943_s14 = sphi %s2044_s14, %s2420_s14   ;;  %s1939_s13 = sphi %s2042_s13, %s2419_s13  }
   0xa   : > { %2394 = sst [smem:[#allocation7_spill]] %s1947_s15  ;;  %s1575_s22 = sadd.s32 4294967294, %s1967_s20  }
   0xb   : > { %2395 = sst [smem:[#allocation8_spill]] %s1959_s18  ;;  %s38_s23 = sadd.s32 1, %s1959_s18 }
   0xc   : > { %2396 = sst [smem:[#allocation9_spill]] %s1963_s19  ;;  %p40_p0 = scmp.ge.s32.totalorder %s38_s23, 2 }
   0xd   : > { %2397 = sst [smem:[#allocation10_spill]] %s1967_s20  ;;  %s42_s24 = sadd.s32 1, %s1963_s19 }
   0xe   : > { %p310_p1 = scmp.ne.s32.totalorder %s1947_s15, %s1943_s14  ;;  %p311_p2 = scmp.eq.s32.totalorder %s1574_s21, 3 }
   0xf   : > { %s2422_s23 = smov (%p40_p0, %s38_s23), 0  ;;  %s2424_s24 = smov (!%p40_p0, %s42_s24), %s1963_s19 }
  0x10   : > { %2398 = sst [smem:[#allocation11_spill]] %s2422_s23  ;;  %p2091_p3 = por %p311_p2, %p310_p1 }
  0x11   : > { %p316_p4 = scmp.ne.s32.totalorder %s1943_s14, %s1939_s13  ;;  %p44_p5 = scmp.ge.s32.totalorder %s2424_s24, 2 }
  0x12   : > { %p317_p6 = scmp.eq.s32.totalorder %s1575_s22, 3  ;;  %p1578_p7 = scmp.ge.s32.totalorder %s1967_s20, 1 }
  0x13   : > { %p400_p8 = scmp.lt.s32.totalorder %s1967_s20, 5  ;;  %s2426_s24 = smov (%p44_p5, %s2424_s24), 0 }
  0x14   : > { %2400 = sst [smem:[#allocation12_spill]] %s2426_s24  ;;  %p2101_p9 = por %p317_p6, %p316_p4 }
  0x15   : > { %p401_p10 = pnand %p1578_p7, %p400_p8  ;;  %s297_s27 = ssub.s32 %s1963_s19, %s2426_s24 }
  0x16   : > { %s2401_s26 = scalar_select %p2101_p9, 1, 0 }
  0x17   : > { %s300_s28 = sadd.s32 1, %s1947_s15  ;;  %p298_p11 = scmp.eq.s32.totalorder %s297_s27, 0 }
  0x18   : > { %2402 = sst [smem:[#allocation13_spill]] %s2401_s26  ;;  %404 = sbr.rel (%p401_p10) target bundleno = 2591 (0xa1f), region = 60 }
  0x19   : > { %s2109_s29 = scalar_select %p298_p11, %s1947_s15, %s300_s28  }
  0x1a   : > { %p466_p12 = scmp.lt.s32.totalorder (!%p401_p10), %s1955_s17, 1  ;;  %p476_p13 = scmp.lt.s32.totalorder (!%p401_p10), %s1951_s16, 1 }
  0x1b   : > { %2403 = sst [smem:[#allocation14_spill]] %s2109_s29  ;;  %s2405_s13 = sand.u32 (!%p401_p10), 1, %s1943_s14  }
  0x1c   : > { %s2404_s0 = sld [smem:[#allocation15_spill]] (!%p401_p10)  ;;  %s2153_s26 = scalar_lea.vmem (!%p401_p10), [#allocation3], %s2405_s13 }
  0x1d   : > { %s2115_s11 = scalar_select %p466_p12, %s1955_s17, 1 }
  0x1e   : > { %s477_s12 = scalar_select %p476_p13, %s1951_s16, 1 }
  0x1f   : > { %s1579_s21 = sshll.u32 %s2115_s11, 2  ;;  %p1589_p0 = scmp.ne.s32.totalorder %s1951_s16, 0 }
  0x20   : > { %s1620_s18 = sshll.u32 %s477_s12, 4  ;;  %s1623_s27 = sshll.u32 %s477_s12, 5 }
  0x21   : > { %s2129_s15 = scalar_lea.vmem %s2373_s3, %s1620_s18  ;;  %s2134_s20 = scalar_lea.vmem %s2374_s4, %s1620_s18 }
  0x22   : > { %s469_s19 = scalar_lea.vmem %s2404_s0, %s1579_s21  ;;  %s2139_s22 = scalar_lea.vmem %s2375_s5, %s1620_s18 }
  0x23   : > { %s2144_s24 = scalar_lea.vmem %s2376_s6, %s1623_s27  ;;  %s1588_s21 = sshll.u32 %s477_s12, 3 }
  0x24   : > { %s499_s0 = scalar_lea.vmem %s2377_s7, %s1588_s21  ;;  %506 = sbr.rel (%p1589_p0) target bundleno = 214 (0xd6), region = 64 }
  0x25   : > { %v2149_v0 = vld [vmem:[%s499_s0] sm:$0xff] }
  0x29   : > { %v507_v1 = vld [vmem:[%s469_s19] sm:$0xf]  ;;  %vm511_vm0 = vcmask 261120  }
  0x2a   : > { %v508_v2 = vunpack.c.l.bf16 %v507_v1  ;;  %v1590_v15 = vld [vmem:[%s2372_s2] ss:$0 sm:$0xff]  ;;  %v1591_v17 = vld [vmem:[%s2372_s2 + $0x1] ss:$0 sm:$0xff] }
  0x2c   : > { %v512_v3 = vsel %vm511_vm0, %v508_v2, 0.0  ;;  %v515_v4 = vmul.f32 %v508_v2, %v508_v2 }
  0x2d   : > { %513 = vadd.xlane.f32.xlu0 %v512_v3 }
  0x2e   : > { %v516_v5 = vsel %vm511_vm0, %v515_v4, 0.0 }
  0x31   : > { %517 = vadd.xlane.f32.xlu0 %v516_v5 }
  0xb6   : > { %v514_v6 = vpop.xlane.xlu0 %513 }
  0xb7   : > { %v519_v7 = vmul.f32 0.03125, %v514_v6 }
  0xb9   : > { %v521_v9 = vmul.f32 %v519_v7, %v519_v7  ;;  %v523_v13 = vsub.f32 %v508_v2, %v519_v7 }
  0xba   : > { %v518_v8 = vpop.xlane.xlu0 %517 }
  0xbb   : > { %v520_v10 = vmul.f32 0.03125, %v518_v8 }
  0xbd   : > { %v522_v11 = vsub.f32 %v520_v10, %v521_v9 }
  0xbf   : > { %v524_v12 = vadd.f32 1e-12, %v522_v11 }
  0xc1   : > { %1837 = vrsqrt.f32 %v524_v12 }
  0xce   : > { %v1838_v14 = vpop.eup %1837 }
  0xcf   : > { %v526_v16 = vmul.f32 %v1838_v14, %v523_v13 }
  0xd1   : > { %v531_v18 = vmul.f32 %v1590_v15, %v526_v16 }
  0xd3   : > { %v536_v19 = vadd.f32 %v1591_v17, %v531_v18 }
  0xd5   : > { %539 = vst.msk [vmem:[#allocation2] sm:$0xff] %vm511_vm0, %v536_v19 }
  0xd6 PF: > { %v1841_v20 = vld [vmem:[%s2129_s15 + $0x8] sm:$0xff]   ;;  %v1969_v21 = vmov 0.0   ;;  %v1842_v22 = vld [vmem:[%s2129_s15] sm:$0xff]   ;;  %vm1970_vm1 = vmmov 0   ;;  %vm575_vm2 = vcmask 261120   ;;  %v541_v25 = vlaneseq  ;;  %s1971_s15 = smov 120   ;;  %s2406_s30 = scalar_lea.vmem %s2371_s1, %s2115_s11 }
  0xd7   : > { %1657 = vmatprep.subr.bf16.mxu0 %v1969_v21  ;;  %1665 = vmatprep.subr.bf16.mxu1 %v1969_v21  ;;  %s1972_s18 = smov 96   ;;  %s1973_s19 = smov 80   ;;  %v540_v35 = vld [vmem:[%s2406_s30] sm:$0x1]  ;;  %v1978_v36 = vmov 0   ;;  %vm623_vm3 = vcmask 64512  }
  0xd8   : > { %1658 = vmatpush3.bf16.msra.mxu0 %v1841_v20  ;;  %1661 = vmatprep.mubr.msk.bf16.mxu0 %vm1970_vm1, %v1969_v21  ;;  %v2182_v26 = vshrl.u32 %v541_v25, 7  ;;  %s1974_s12 = smov 88   ;;  %s1975_s28 = smov 72   ;;  %v542_v49 = vand.u32 127, %v541_v25  ;;  %vm690_vm5 = vcmask 1043456   ;;  %vm1080_vm6 = vcmask 130048  }
  0xd9   : > { %1659 = vmatprep.subr.bf16.mxu0 %v1969_v21  ;;  %1667 = vmatprep.mubr.msk.bf16.mxu1 %vm1970_vm1, %v1969_v21  ;;  %s1976_s27 = smov 112   ;;  %s1977_s23 = smov 104   ;;  %vm1082_vm7 = vcmask 195584   ;;  %vm1284_vm8 = vcmask 523264  }
  0xda   : > { %v548_v27 = vsub.s32 0, %v2182_v26  ;;  %1839 = vset.pattern.permute.xlu1 %v1978_v36  ;;  %1840 = vset.pattern.permute.xlu0 %v1978_v36  ;;  %s1979_s11 = smov 64   ;;  %s1980_s13 = smov 56  }
  0xdb   : > { %s1981_s0 = smov 48   ;;  %s1982_s9 = smov 40  }
  0xdc   : > { %v2171_v23 = vld [vmem:[#allocation2] sm:$0xff]  ;;  %1660 = vmatpush3.bf16.msra.mxu0 %v1842_v22  ;;  %v562_v28 = vrot.slane %v2149_v0, %v548_v27  ;;  %s1983_s10 = smov 8   ;;  %s1984_s16 = smov 16  }
  0xdd   : > { %v554_v24 = vpack.c.bf16 %v2171_v23, %v2171_v23  ;;  %1671 = vmatprep.subr.bf16.mxu0 %v1969_v21  ;;  %s2408_s30 = sld [smem:[#allocation17_spill]] }
  0xdf   : > { %1662 = vmatmul.mubr.msk.bf16.vlgmr.msra.gmra.mxu0 %vm575_vm2, %v554_v24 }
  0xe0   : > { %1673 = vmatprep.mubr.msk.bf16.mxu0 %vm1970_vm1, %v1969_v21 }
 0x19f   : > { %v613_v29 = vpop.f32.mrf.mxu0 }
 0x1a0   : > { %v614_v30 = vadd.f32 %v613_v29, %v562_v28 }
 0x1a1   : > { %v1663_v31 = vpop.f32.mrf.mxu0 }
 0x1a2   : > { %v2186_v32 = vpack.c.bf16 %v614_v30, %v614_v30 }
 0x1a3   : > { %v616_v33 = vpop.f32.mrf.mxu0 }
 0x1a4   : > { %734 = vrot.lane.b32.xlu1 %v2186_v32, %s1971_s15  ;;  %621 = vrot.lane.b32.xlu0 %v2186_v32, %s1972_s18  ;;  %s1985_s15 = smov 24  }
 0x1a5   : > { %v1664_v34 = vpop.f32.mrf.mxu0 }
 0x1a8   : > { %847 = vrot.lane.b32.xlu1 %v2186_v32, %s1973_s19  ;;  %736 = vrot.lane.b32.xlu0 %v2186_v32, %s1974_s12 }
 0x1ac   : > { %958 = vrot.lane.b32.xlu1 %v2186_v32, %s1975_s28  ;;  %845 = vrot.lane.b32.xlu0 %v2186_v32, %s1976_s27  ;;  %s2407_s28 = sld [smem:[#allocation16_spill]]  ;;  %s1617_s27 = sshll.u32 %s1955_s17, 4 }
 0x1ad   : > { %s1986_s17 = smov [#allocation3]  }
 0x1b0   : > { %956 = vrot.lane.b32.xlu0 %v2186_v32, %s1977_s23  ;;  %544 = vperm.xlu1 %1839, %v540_v35   ;;  %s1431_s23 = sshll.u32 %s2153_s26, 4  ;;  %s2317_s23 = int_to_ptr.vmem [resolvable:$true] %s1431_s23 }
 0x216   : > { %v622_v37 = vpop.permute.xlu0 %621  ;;  %v735_v40 = vpop.permute.xlu1 %734 }
 0x217   : > { %v628_v38 = vsel %vm623_vm3, %v622_v37, 0 }
 0x218   : > { %1666 = vmatpush3.bf16.xpose.msra.mxu1 %v628_v38 }
 0x219   : > { %1677 = vmatprep.subr.bf16.mxu1 %v1969_v21 }
 0x21a   : > { %v737_v39 = vpop.permute.xlu0 %736  ;;  %v848_v42 = vpop.permute.xlu1 %847 }
 0x21b   : > { %v742_v41 = vsel %vm623_vm3, %v737_v39, 0  ;;  %v853_v43 = vsel %vm623_vm3, %v848_v42, 0 }
 0x21e   : > { %v959_v44 = vpop.permute.xlu1 %958  ;;  %v846_v45 = vpop.permute.xlu0 %845 }
 0x21f   : > { %1668 = vmatmul.mubr.msk.bf16.vlgmr.msra.gmra.mxu1 %vm623_vm3, %v2186_v32  ;;  %v964_v46 = vsel %vm623_vm3, %v959_v44, 0 }
 0x220   : > { %1678 = vmatpush3.bf16.xpose.msra.mxu1 %v742_v41  ;;  %1679 = vmatprep.mubr.msk.bf16.mxu1 %vm1970_vm1, %v1969_v21 }
 0x221   : > { %1689 = vmatprep.subr.bf16.mxu1 %v1969_v21 }
 0x222   : > { %v957_v47 = vpop.permute.xlu0 %956 }
 0x227   : > { %1680 = vmatmul.mubr.msk.bf16.vlgmr.msra.gmra.mxu1 %vm623_vm3, %v735_v40 }
 0x228   : > { %1690 = vmatpush3.bf16.xpose.msra.mxu1 %v853_v43  ;;  %1691 = vmatprep.mubr.msk.bf16.mxu1 %vm1970_vm1, %v1969_v21 }
 0x229   : > { %1701 = vmatprep.subr.bf16.mxu1 %v1969_v21 }
 0x22b   : > { %v545_v48 = vpop.permute.xlu1 %544 }
 0x22c   : > { %v549_v50 = vrot.slane %v545_v48, %v548_v27 }
 0x22e   : > { %vm550_vm4 = vcmp.lt.s32.totalorder %v542_v49, %v549_v50 }
 0x22f   : > { %1692 = vmatmul.mubr.msk.bf16.vlgmr.msra.gmra.mxu1 %vm623_vm3, %v846_v45 }
 0x230   : > { %1702 = vmatpush3.bf16.xpose.msra.mxu1 %v964_v46  ;;  %1703 = vmatprep.mubr.msk.bf16.mxu1 %vm1970_vm1, %v1969_v21 }
 0x231   : > { %1713 = vmatprep.subr.bf16.mxu1 %v1969_v21 }
 0x237   : > { %1704 = vmatmul.mubr.msk.bf16.vlgmr.msra.gmra.mxu1 %vm623_vm3, %v957_v47 }
 0x238   : > { %1717 = vmatprep.mubr.msk.bf16.mxu1 %vm1970_vm1, %v1969_v21 }
 0x2df   : > { %v664_v51 = vpop.f32.mrf.mxu1 }
 0x2e0   : > { %v672_v52 = vsel %vm550_vm4, %v664_v51, -3.4028235e+38 }
 0x2e1   : > { %v1669_v53 = vpop.f32.mrf.mxu1  ;;  %v673_v54 = vsel %vm623_vm3, %v672_v52, -inf }
 0x2e2   : > { %674 = vmax.xlane.f32.xlu0 %v673_v54 }
 0x2e3   : > { %v667_v55 = vpop.f32.mrf.mxu1 }
 0x2e5   : > { %v1670_v56 = vpop.f32.mrf.mxu1 }
 0x2e7   : > { %v778_v57 = vpop.f32.mrf.mxu1 }
 0x2e8   : > { %v784_v58 = vsel %vm550_vm4, %v778_v57, -3.4028235e+38 }
 0x2e9   : > { %v1681_v59 = vpop.f32.mrf.mxu1  ;;  %v785_v60 = vsel %vm623_vm3, %v784_v58, -inf }
 0x2ea   : > { %786 = vmax.xlane.f32.xlu1 %v785_v60 }
 0x2eb   : > { %v781_v61 = vpop.f32.mrf.mxu1 }
 0x2ed   : > { %v1682_v62 = vpop.f32.mrf.mxu1 }
 0x2ef   : > { %v889_v63 = vpop.f32.mrf.mxu1 }
 0x2f0   : > { %v895_v1 = vsel %vm550_vm4, %v889_v63, -3.4028235e+38 }
 0x2f1   : > { %v1693_v2 = vpop.f32.mrf.mxu1  ;;  %v896_v3 = vsel %vm623_vm3, %v895_v1, -inf }
 0x2f2   : > { %897 = vmax.xlane.f32.xlu0 %v896_v3 }
 0x2f3   : > { %v892_v4 = vpop.f32.mrf.mxu1 }
 0x2f4   : > { %v1843_v4 = vld [vmem:[%s2134_s20 + $0x8] sm:$0xff]  }
 0x2f5   : > { %v1694_v5 = vpop.f32.mrf.mxu1  ;;  %1714 = vmatpush3.bf16.msra.mxu1 %v1843_v4 }
 0x2f6   : > { %v1844_v5 = vld [vmem:[%s2134_s20] sm:$0xff]   ;;  %1715 = vmatprep.subr.bf16.mxu1 %v1969_v21 }
 0x2f7   : > { %v1000_v6 = vpop.f32.mrf.mxu1 }
 0x2f8   : > { %v1006_v7 = vsel %vm550_vm4, %v1000_v6, -3.4028235e+38 }
 0x2f9   : > { %v1705_v8 = vpop.f32.mrf.mxu1  ;;  %v1007_v9 = vsel %vm623_vm3, %v1006_v7, -inf  ;;  %1716 = vmatpush3.bf16.msra.mxu1 %v1844_v5 }
 0x2fa   : > { %1008 = vmax.xlane.f32.xlu0 %v1007_v9  ;;  %1729 = vmatprep.subr.bf16.mxu1 %v1969_v21 }
 0x2fb   : > { %v1003_v10 = vpop.f32.mrf.mxu1 }
 0x2fd   : > { %v1706_v11 = vpop.f32.mrf.mxu1 }
 0x36b   : > { %v675_v12 = vpop.xlane.xlu0 %674 }
 0x36c   : > { %v676_v13 = vsub.f32 %v672_v52, %v675_v12 }
 0x36e   : > { %v677_v14 = vmul.f32 1.442695, %v676_v13 }
 0x370   : > { %1853 = vpow2.f32 %v677_v14 }
 0x373   : > { %v787_v15 = vpop.xlane.xlu1 %786 }
 0x374   : > { %v788_v16 = vsub.f32 %v784_v58, %v787_v15 }
 0x376   : > { %v789_v17 = vmul.f32 1.442695, %v788_v16 }
 0x378   : > { %1855 = vpow2.f32 %v789_v17 }
 0x37b   : > { %v898_v20 = vpop.xlane.xlu0 %897 }
 0x37c   : > { %v899_v31 = vsub.f32 %v895_v1, %v898_v20 }
 0x37d   : > { %v1854_v18 = vpop.eup %1853 }
 0x37e   : > { %v679_v19 = vsel %vm623_vm3, %v1854_v18, 0.0  ;;  %v900_v33 = vmul.f32 1.442695, %v899_v31 }
 0x37f   : > { %680 = vadd.xlane.f32.xlu1 %v679_v19 }
 0x383   : > { %v1009_v22 = vpop.xlane.xlu0 %1008 }
 0x384   : > { %v1010_v24 = vsub.f32 %v1006_v7, %v1009_v22  ;;  %v1091_v22 = vsub.s32 1, %v2182_v26 }
 0x385   : > { %v1856_v25 = vpop.eup %1855 }
 0x386   : > { %v1011_v27 = vmul.f32 1.442695, %v1010_v24  ;;  %v791_v28 = vsel %vm623_vm3, %v1856_v25, 0.0  ;;  %v1092_v24 = vrot.slane %v2149_v0, %v1091_v22 }
 0x387   : > { %792 = vadd.xlane.f32.xlu0 %v791_v28 }
 0x388   : > { %1857 = vpow2.f32 %v1011_v27 }
 0x389   : > { %1859 = vpow2.f32 %v900_v33 }
 0x390   : > { %685 = vrot.lane.b32.xlu1 %v2186_v32, %s1979_s11  ;;  %s2315_s11 = scalar_lea.hbm %s2408_s30, %s1617_s27 }
 0x395   : > { %v1858_v29 = vpop.eup %1857 }
 0x396   : > { %v1013_v30 = vsel %vm623_vm3, %v1858_v29, 0.0  ;;  %v1860_v34 = vpop.eup %1859 }
 0x397   : > { %1014 = vadd.xlane.f32.xlu0 %v1013_v30  ;;  %v902_v35 = vsel %vm623_vm3, %v1860_v34, 0.0 }
 0x3ad   : > { %797 = vrot.lane.b32.xlu0 %v2186_v32, %s1980_s13  ;;  %s2409_s13 = sand.u32 1, %s1943_s14  }
 0x3b4   : > { %903 = vadd.xlane.f32.xlu1 %v902_v35 }
 0x3c5   : > { %908 = vrot.lane.b32.xlu1 %v2186_v32, %s1981_s0  ;;  %s1418_s0 = scalar_lea.sflag [#allocation4], %s2409_s13 }
 0x3c9   : > { %1019 = vrot.lane.b32.xlu1 %v2186_v32, %s1982_s9  ;;  %s1875_s9 = scalar_lea.vmem %s2317_s23, 16 }
 0x3ca   : > { %p1876_p1 = scmp.ne.s32.totalorder %s2317_s23, %s1875_s9 }
 0x3cc   : > { %p1877_p2 = pnand %p1876_p1, %p2091_p3 }
 0x3ce   : > { %p1878_p4 = pneg %p1877_p2 }
 0x408   : > { %v681_v36 = vpop.xlane.xlu1 %680 }
 0x409   : > { %1861 = vrcp.f32 %v681_v36  ;;  %v1845_v36 = vld [vmem:[%s2139_s22 + $0x8] sm:$0xff]  }
 0x40c   : > { %v686_v37 = vpop.permute.xlu1 %685 }
 0x40d   : > { %v692_v38 = vsel %vm690_vm5, %v686_v37, 0  ;;  %v1846_v37 = vld [vmem:[%s2139_s22] sm:$0xff]  }
 0x40e   : > { %1672 = vmatpush3.bf16.msra.mxu0 %v692_v38 }
 0x40f   : > { %1683 = vmatprep.subr.bf16.mxu0 %v1969_v21 }
 0x410   : > { %v793_v39 = vpop.xlane.xlu0 %792 }
 0x411   : > { %1863 = vrcp.f32 %v793_v39 }
 0x416   : > { %v1862_v40 = vpop.eup %1861 }
 0x417   : > { %v683_v41 = vmul.f32 %v1862_v40, %v1854_v18 }
 0x419   : > { %v684_v42 = vpack.c.bf16 %v683_v41, %v683_v41 }
 0x41b   : > { %1674 = vmatmul.mubr.msk.bf16.vlgmr.msra.gmra.mxu0 %vm623_vm3, %v684_v42 }
 0x41c   : > { %1685 = vmatprep.mubr.msk.bf16.mxu0 %vm1970_vm1, %v1969_v21 }
 0x41e   : > { %v1864_v32 = vpop.eup %1863 }
 0x41f   : > { %v795_v44 = vmul.f32 %v1864_v32, %v1856_v25 }
 0x420   : > { %v1015_v43 = vpop.xlane.xlu0 %1014 }
 0x421   : > { %v796_v47 = vpack.c.bf16 %v795_v44, %v795_v44  ;;  %v1171_v44 = vsub.s32 3, %v2182_v26 }
 0x424   : > { %v798_v45 = vpop.permute.xlu0 %797 }
 0x425   : > { %v803_v46 = vsel %vm690_vm5, %v798_v45, 0 }
 0x426   : > { %1684 = vmatpush3.bf16.msra.mxu0 %v803_v46 }
 0x427   : > { %1695 = vmatprep.subr.bf16.mxu0 %v1969_v21 }
 0x429   : > { %1686 = vmatmul.mubr.msk.bf16.vlgmr.msra.gmra.mxu0 %vm623_vm3, %v796_v47 }
 0x42a   : > { %1697 = vmatprep.mubr.msk.bf16.mxu0 %vm1970_vm1, %v1969_v21 }
 0x43d   : > { %v904_v48 = vpop.xlane.xlu1 %903 }
 0x43e   : > { %1865 = vrcp.f32 %v904_v48 }
 0x43f   : > { %1867 = vrcp.f32 %v1015_v43  ;;  %v1166_v43 = vsub.s32 2, %v2182_v26 }
 0x441   : > { %v909_v49 = vpop.permute.xlu1 %908  ;;  %v1167_v46 = vrot.slane %v2149_v0, %v1166_v43 }
 0x442   : > { %v914_v50 = vsel %vm690_vm5, %v909_v49, 0  ;;  %v1172_v49 = vrot.slane %v2149_v0, %v1171_v44 }
 0x443   : > { %1696 = vmatpush3.bf16.msra.mxu0 %v914_v50 }
 0x444   : > { %1707 = vmatprep.subr.bf16.mxu0 %v1969_v21 }
 0x445   : > { %v1020_v53 = vpop.permute.xlu1 %1019 }
 0x446   : > { %v1025_v56 = vsel %vm690_vm5, %v1020_v53, 0  ;;  %v1847_v53 = vld [vmem:[%s2144_s24 + $0x18] sm:$0xff]  }
 0x44b   : > { %v1866_v51 = vpop.eup %1865 }
 0x44c   : > { %v906_v52 = vmul.f32 %v1866_v51, %v1860_v34  ;;  %v1868_v55 = vpop.eup %1867 }
 0x44d   : > { %v1017_v57 = vmul.f32 %v1868_v55, %v1858_v29  ;;  %v1849_v55 = vld [vmem:[%s2144_s24 + $0x8] sm:$0xff]  }
 0x44e   : > { %v907_v54 = vpack.c.bf16 %v906_v52, %v906_v52 }
 0x44f   : > { %v1018_v58 = vpack.c.bf16 %v1017_v57, %v1017_v57  ;;  %v1181_v57 = vsub.s32 4, %v2182_v26 }
 0x450   : > { %1698 = vmatmul.mubr.msk.bf16.vlgmr.msra.gmra.mxu0 %vm623_vm3, %v907_v54  ;;  %v1848_v54 = vld [vmem:[%s2144_s24 + $0x10] sm:$0xff]  }
 0x451   : > { %1708 = vmatpush3.bf16.msra.mxu0 %v1025_v56  ;;  %1709 = vmatprep.mubr.msk.bf16.mxu0 %vm1970_vm1, %v1969_v21  ;;  %v1850_v56 = vld [vmem:[%s2144_s24] sm:$0xff]  }
 0x452   : > { %1721 = vmatprep.subr.bf16.mxu0 %v1969_v21 }
 0x458   : > { %1710 = vmatmul.mubr.msk.bf16.vlgmr.msra.gmra.mxu0 %vm623_vm3, %v1018_v58  ;;  %v1182_v58 = vrot.slane %v2149_v0, %v1181_v57 }
 0x459   : > { %1725 = vmatprep.mubr.msk.bf16.mxu0 %vm1970_vm1, %v1969_v21  ;;  %1722 = vmatpush3.bf16.msra.mxu0 %v1845_v36  ;;  %v1351_v36 = vsub.s32 7, %v2182_v26 }
 0x45a   : > { %1723 = vmatprep.subr.bf16.mxu0 %v1969_v21 }
 0x45d   : > { %1724 = vmatpush3.bf16.msra.mxu0 %v1846_v37 }
 0x45e   : > { %1741 = vmatprep.subr.bf16.mxu0 %v1969_v21 }
 0x4db   : > { %v728_v59 = vpop.f32.mrf.mxu0 }
 0x4dd   : > { %v1675_v60 = vpop.f32.mrf.mxu0 }
 0x4df   : > { %v731_v61 = vpop.f32.mrf.mxu0 }
 0x4e1   : > { %v1676_v62 = vpop.f32.mrf.mxu0 }
 0x4e9   : > { %v839_v63 = vpop.f32.mrf.mxu0 }
 0x4ea   : > { %1068 = vrot.lane.b32.xlu0 %v839_v63, %s1983_s10  ;;  %s1879_s10 = sshll.u32 %s1986_s17, 4  ;;  %s1880_s10 = int_to_ptr.vmem [resolvable:$false] %s1879_s10 }
 0x4eb   : > { %v1687_v1 = vpop.f32.mrf.mxu0  ;;  %p1882_p5 = scmp.lt.s32.totalorder %s2317_s23, %s1880_s10 }
 0x4ed   : > { %v842_v2 = vpop.f32.mrf.mxu0 }
 0x4ef   : > { %v1688_v3 = vpop.f32.mrf.mxu0 }
 0x510   : > { %v950_v6 = vpop.f32.mrf.mxu0 }
 0x511   : > { %1072 = vrot.lane.b32.xlu1 %v950_v6, %s1984_s16  ;;  %s1881_s16 = scalar_lea.vmem %s1880_s10, 32 }
 0x512   : > { %v1699_v7 = vpop.f32.mrf.mxu0  ;;  %p1883_p6 = scmp.lt.s32.totalorder %s1881_s16, %s1875_s9 }
 0x514   : > { %v953_v8 = vpop.f32.mrf.mxu0  ;;  %p1884_p7 = por %p1883_p6, %p1882_p5 }
 0x516   : > { %v1700_v9 = vpop.f32.mrf.mxu0  ;;  %p1885_p8 = pnand %p1884_p7, %p1878_p4 }
 0x518   : > { %v1061_v10 = vpop.f32.mrf.mxu0 }
 0x519   : > { %1076 = vrot.lane.b32.xlu0 %v1061_v10, %s1985_s15 }
 0x51a   : > { %v1711_v11 = vpop.f32.mrf.mxu0 }
 0x51b   : > { %v1258_v11 = vsub.s32 5, %v2182_v26 }
 0x51c   : > { %v1064_v12 = vpop.f32.mrf.mxu0 }
 0x51d   : > { %v1259_v12 = vrot.slane %v2149_v0, %v1258_v11 }
 0x51e   : > { %v1712_v13 = vpop.f32.mrf.mxu0 }
 0x55c   : > { %v1069_v14 = vpop.permute.xlu0 %1068 }
 0x55d   : > { %v1079_v16 = vsel %vm623_vm3, %v728_v59, %v1069_v14 }
 0x583   : > { %v1073_v15 = vpop.permute.xlu1 %1072 }
 0x584   : > { %v1081_v17 = vsel %vm1080_vm6, %v1079_v16, %v1073_v15 }
 0x58b   : > { %v1077_v18 = vpop.permute.xlu0 %1076 }
 0x58c   : > { %v1083_v19 = vsel %vm1082_vm7, %v1081_v17, %v1077_v18 }
 0x58d   : > { %v1084_v20 = vpack.c.bf16 %v1083_v19, %v1083_v19 }
 0x58f   : > { %1718 = vmatmul.mubr.msk.bf16.vlgmr.msra.gmra.mxu1 %vm575_vm2, %v1084_v20 }
 0x590   : > { %1737 = vmatprep.mubr.msk.bf16.mxu1 %vm1970_vm1, %v1969_v21  ;;  %1730 = vmatpush3.bf16.msra.mxu1 %v1847_v53 }
 0x591   : > { %1731 = vmatprep.subr.bf16.mxu1 %v1969_v21 }
 0x594   : > { %1732 = vmatpush3.bf16.msra.mxu1 %v1848_v54 }
 0x595   : > { %1733 = vmatprep.subr.bf16.mxu1 %v1969_v21 }
 0x598   : > { %1734 = vmatpush3.bf16.msra.mxu1 %v1849_v55 }
 0x599   : > { %1735 = vmatprep.subr.bf16.mxu1 %v1969_v21 }
 0x59c   : > { %1736 = vmatpush3.bf16.msra.mxu1 %v1850_v56 }
 0x64f   : > { %v1142_v25 = vpop.f32.mrf.mxu1 }
 0x650   : > { %v1143_v27 = vadd.f32 %v1142_v25, %v1092_v24  ;;  %v1851_v24 = vld [vmem:[%s2378_s8 + $0x8] sm:$0xff]   ;;  %v1852_v25 = vld [vmem:[%s2378_s8] sm:$0xff]  }
 0x651   : > { %v1719_v28 = vpop.f32.mrf.mxu1 }
 0x652   : > { %v1148_v29 = vadd.f32 %v1143_v27, %v2171_v23 }
 0x653   : > { %v1145_v30 = vpop.f32.mrf.mxu1 }
 0x654   : > { %v1149_v31 = vsel %vm575_vm2, %v1148_v29, 0.0  ;;  %v1152_v33 = vmul.f32 %v1148_v29, %v1148_v29 }
 0x655   : > { %1150 = vadd.xlane.f32.xlu1 %v1149_v31  ;;  %v1720_v34 = vpop.f32.mrf.mxu1 }
 0x656   : > { %v1153_v35 = vsel %vm575_vm2, %v1152_v33, 0.0 }
 0x657   : > { %1154 = vadd.xlane.f32.xlu0 %v1153_v35  ;;  %v1346_v35 = vsub.s32 6, %v2182_v26  ;;  %v1360_v26 = vld [vmem:[%s2407_s28] sm:$0x1] }
 0x6de   : > { %v1151_v38 = vpop.xlane.xlu1 %1150 }
 0x6df   : > { %v1156_v39 = vmul.f32 0.03125, %v1151_v38  ;;  %v1347_v38 = vrot.slane %v2149_v0, %v1346_v35 }
 0x6e0   : > { %v1155_v23 = vpop.xlane.xlu0 %1154 }
 0x6e1   : > { %v1158_v40 = vmul.f32 %v1156_v39, %v1156_v39  ;;  %v1157_v41 = vmul.f32 0.03125, %v1155_v23  ;;  %v1160_v45 = vsub.f32 %v1148_v29, %v1156_v39  ;;  %v1352_v23 = vrot.slane %v2149_v0, %v1351_v36 }
 0x6e3   : > { %v1159_v42 = vsub.f32 %v1157_v41, %v1158_v40 }
 0x6e5   : > { %v1161_v32 = vadd.f32 1e-12, %v1159_v42 }
 0x6e7   : > { %1869 = vrsqrt.f32 %v1161_v32 }
 0x6f4   : > { %v1870_v47 = vpop.eup %1869 }
 0x6f5   : > { %v1163_v48 = vmul.f32 %v1870_v47, %v1160_v45 }
 0x6f7   : > { %v1168_v50 = vmul.f32 %v1167_v46, %v1163_v48 }
 0x6f9   : > { %v1173_v51 = vadd.f32 %v1172_v49, %v1168_v50 }
 0x6fb   : > { %v1174_v52 = vpack.c.bf16 %v1173_v51, %v1173_v51 }
 0x6fd   : > { %1726 = vmatmul.mubr.msk.bf16.vlgmr.msra.gmra.mxu0 %vm575_vm2, %v1174_v52 }
 0x6fe   : > { %1745 = vmatprep.mubr.msk.bf16.mxu0 %vm1970_vm1, %v1969_v21  ;;  %1742 = vmatpush3.bf16.msra.mxu0 %v1851_v24 }
 0x6ff   : > { %1743 = vmatprep.subr.bf16.mxu0 %v1969_v21 }
 0x702   : > { %1744 = vmatpush3.bf16.msra.mxu0 %v1852_v25 }
 0x7bd   : > { %v1232_v59 = vpop.f32.mrf.mxu0 }
 0x7be   : > { %v1233_v60 = vadd.f32 %v1232_v59, %v1182_v58 }
 0x7bf   : > { %v1727_v61 = vpop.f32.mrf.mxu0 }
 0x7c0   : > { %v1238_v62 = vmul.f32 %v1233_v60, %v1233_v60 }
 0x7c1   : > { %v1235_v63 = vpop.f32.mrf.mxu0 }
 0x7c2   : > { %v1239_v1 = vmul.f32 %v1238_v62, %v1233_v60 }
 0x7c3   : > { %v1728_v2 = vpop.f32.mrf.mxu0 }
 0x7c4   : > { %v1240_v3 = vmul.f32 0.044715, %v1239_v1 }
 0x7c6   : > { %v1241_v4 = vadd.f32 %v1240_v3, %v1233_v60 }
 0x7c8   : > { %v1242_v5 = vmul.f32 0.7978846, %v1241_v4 }
 0x7ca   : > { %1871 = vtanh.f32 %v1242_v5 }
 0x7d7   : > { %v1872_v6 = vpop.eup %1871 }
 0x7d8   : > { %v1244_v7 = vadd.f32 1.0, %v1872_v6 }
 0x7da   : > { %v1245_v8 = vmul.f32 0.5, %v1244_v7 }
 0x7dc   : > { %v1246_v9 = vmul.f32 %v1245_v8, %v1233_v60 }
 0x7de   : > { %v1247_v10 = vpack.c.bf16 %v1246_v9, %v1246_v9 }
 0x7e0   : > { %1738 = vmatmul.mubr.msk.bf16.vlgmr.msra.gmra.mxu1 %vm1284_vm8, %v1247_v10 }
 0x8a0   : > { %v1322_v13 = vpop.f32.mrf.mxu1 }
 0x8a1   : > { %v1323_v14 = vadd.f32 %v1322_v13, %v1259_v12 }
 0x8a2   : > { %v1739_v15 = vpop.f32.mrf.mxu1 }
 0x8a3   : > { %v1328_v16 = vadd.f32 %v1323_v14, %v1173_v51 }
 0x8a4   : > { %v1325_v17 = vpop.f32.mrf.mxu1 }
 0x8a5   : > { %v1329_v18 = vsel %vm575_vm2, %v1328_v16, 0.0  ;;  %v1332_v19 = vmul.f32 %v1328_v16, %v1328_v16 }
 0x8a6   : > { %1330 = vadd.xlane.f32.xlu0 %v1329_v18  ;;  %v1740_v20 = vpop.f32.mrf.mxu1 }
 0x8a7   : > { %v1333_v22 = vsel %vm575_vm2, %v1332_v19, 0.0 }
 0x8a8   : > { %1334 = vadd.xlane.f32.xlu1 %v1333_v22 }
 0x92f   : > { %v1331_v27 = vpop.xlane.xlu0 %1330 }
 0x930   : > { %v1336_v28 = vmul.f32 0.03125, %v1331_v27 }
 0x931   : > { %v1335_v29 = vpop.xlane.xlu1 %1334 }
 0x932   : > { %v1338_v30 = vmul.f32 %v1336_v28, %v1336_v28  ;;  %v1337_v31 = vmul.f32 0.03125, %v1335_v29  ;;  %v1340_v37 = vsub.f32 %v1328_v16, %v1336_v28 }
 0x934   : > { %v1339_v33 = vsub.f32 %v1337_v31, %v1338_v30 }
 0x936   : > { %v1341_v34 = vadd.f32 1e-12, %v1339_v33 }
 0x938   : > { %1873 = vrsqrt.f32 %v1341_v34 }
 0x945   : > { %v1874_v39 = vpop.eup %1873 }
 0x946   : > { %v1343_v21 = vmul.f32 %v1874_v39, %v1340_v37 }
 0x948   : > { %v1348_v40 = vmul.f32 %v1347_v38, %v1343_v21 }
 0x94a   : > { %v1353_v41 = vadd.f32 %v1352_v23, %v1348_v40 }
 0x94c   : > { %1354 = vst.msk [vmem:[#allocation2] sm:$0xff] %vm575_vm2, %v1353_v41  ;;  %v1355_v42 = vpack.c.bf16 %v1353_v41, %v1353_v41 }
 0x94e   : > { %1746 = vmatmul.mubr.msk.bf16.vlgmr.msra.gmra.mxu0 %vm575_vm2, %v1355_v42 }
 0xa0e   : > { %v1410_v32 = vpop.f32.mrf.mxu0 }
 0xa0f   : > { %v1411_v43 = vadd.f32 %v1410_v32, %v1360_v26 }
 0xa10   : > { %v1747_v0 = vpop.f32.mrf.mxu0 }
 0xa11   : > { %1416 = vst [vmem:[%s2153_s26] sm:$0x1] %v1411_v43 }
 0xa12   : > { %v1413_v44 = vpop.f32.mrf.mxu0 }
 0xa13   : > { %1888 = shalt.err (!%p1885_p8)
}
 0xa14   : > { %s1889_s26 = scalar_lea.hbm %s2315_s11, 16  ;;  %s1893_s22 = scalar_lea.hbm %s2408_s30, 32 }
 0xa15   : > { %p1890_p10 = scmp.ne.s32.totalorder %s2315_s11, %s1889_s26  ;;  %p1894_p13 = scmp.lt.s32.totalorder %s2315_s11, %s2408_s30 }
 0xa16   : > { %p1895_p0 = scmp.lt.s32.totalorder %s1893_s22, %s1889_s26 }
 0xa17   : > { %p1891_p11 = pnand %p1890_p10, %p2091_p3 }
 0xa18   : > { %p1896_p1 = por %p1895_p0, %p1894_p13 }
 0xa19   : > { %p1892_p12 = pneg %p1891_p11 }
 0xa1b   : > { %p1897_p2 = pnand %p1896_p1, %p1892_p12 }
 0xa1d   : > { %1900 = shalt.err (!%p1897_p2)
}
 0xa1e   : > { %1749 = dma.vmem_to_hbm [thread:$0]  (%p2091_p3), %s2317_s23, 16, %s2315_s11, %s1418_s0   ;;  %v1748_v45 = vpop.f32.mrf.mxu0 }
 0xa1f PF: > { %s2410_s19 = sld [smem:[#allocation10_spill]] }
 0xa20   : > { %s2411_s12 = sld [smem:[#allocation6_spill]] }
 0xa25   : > { %p1755_p4 = scmp.ge.s32.totalorder %s2410_s19, 2 }
 0xa26   : > { %s1443_s27 = sand.u32 1, %s2411_s12  }
 0xa27   : > { %p1752_p5 = pnand %p1755_p4, %p2101_p9  ;;  %s1444_s21 = scalar_lea.sflag [#allocation4], %s1443_s27 }
 0xa29   : > { %p1753_p6 = pneg %p1752_p5 }
 0xa2b   : > { %1934 = dma.done.wait (%p1753_p6), %s1444_s21, 16  }
 0xa2c   : > { %1936 = vsyncadd (%p1753_p6), %s1444_s21, 4294967280  ;;  %s23_s20 = sadd.s32 1, %s2410_s19   ;;  %s2413_s25 = sld [smem:[#allocation7_spill]] }
 0xa2d   : > { %p20_p7 = scmp.ge.s32.totalorder %s23_s20, 6   ;;  %s2414_s15 = sld [smem:[#allocation14_spill]] }
 0xa2e   : > { %s2415_s16 = sld [smem:[#allocation8_spill]]  ;;  %s2419_s13 = smov %s1943_s14 }
 0xa2f   : > { %s2416_s17 = sld [smem:[#allocation9_spill]]  ;;  %22 = sbr.rel (!%p20_p7) target bundleno = 9 (0x9), region = 119 }
 0xa30   : > { %s2417_s18 = sld [smem:[#allocation11_spill]] }
 0xa31   : > { %s2418_s19 = sld [smem:[#allocation12_spill]] }
 0xa32   : > { %s2420_s14 = smov %s2413_s25 }
 0xa34   :  { %1448 = vsyncpa [#allocation4], 1 }
 0xa35   :  { %1450 = vsyncpa [#allocation4 + $0x1], 1 }

</bundles_post_ra>
